<compile_context>
chip_gen: v7x
topology: tpu7x:2x2x1
jax: 0.10.0
libtpu: 0.0.40
codegen_flags: <defaults>
</compile_context>

<pallas_src>
import math

import jax
import jax.numpy as jnp
from jax.experimental import pallas as pl
from jax.experimental.pallas import tpu as pltpu

# ---- model hyper-parameters (small, consistent with the module, scaled down) ----
VOCAB = 16
D_MODEL = 32
NHEAD = 4
HEAD_DIM = D_MODEL // NHEAD
DIM_FF = 64
NUM_LAYERS = 2
SEQ = 8
BATCH = 2
LN_EPS = 1e-5
MAX_LEN = 512

VEC_ROWS = 8                          # per-layer f32 vector rows (6 used, padded to 8 sublanes)
EMB_OFF = NUM_LAYERS * VEC_ROWS       # row offset of the embedding table inside the f32 slab
PE_OFF = EMB_OFF + VOCAB              # row offset of the positional-encoding rows


# ----------------------------------------------------------------------------------------
# Fused Pallas kernel: embedding + pos-enc + encoder stack + last-token fc_out
# ----------------------------------------------------------------------------------------
def _charformer_kernel(src_ref,      # SMEM (B, S) int32   token ids (scalar prefetch)
                       wqkv_ref,     # (L, D, 3D)    bf16  packed [Wq | Wk | Wv], (in,out) layout
                       bqkv_ref,     # (L, 1, 3D)    f32
                       wow2_ref,     # (L, D+FF, D)  bf16  rows [0:D]=W_o, rows [D:D+FF]=W_2
                       w1_ref,       # (L, D, FF)    bf16
                       b1_ref,       # (L, 1, FF)    f32
                       f32v_ref,     # (L*8+V+S, D)  f32   per-layer vecs | embedding | pos-enc
                       fcw_ref,      # (D, V)        bf16
                       fcb_ref,      # (1, V)        f32
                       out_ref,      # (B, V)        f32   logits
                       x_scr):       # VMEM scratch (B*S, D) f32
    B, S = src_ref.shape
    L, D, _ = wqkv_ref.shape
    FF = w1_ref.shape[2]
    H, HD = NHEAD, HEAD_DIM
    scale = 1.0 / math.sqrt(HD)

    def layer_norm(z, gamma, beta):
        mu = jnp.mean(z, axis=-1, keepdims=True)
        var = jnp.mean((z - mu) ** 2, axis=-1, keepdims=True)
        return (z - mu) * jax.lax.rsqrt(var + LN_EPS) * gamma + beta

    # ---- fused embedding gather + positional encoding (token ids read from SMEM) ----
    for b in range(B):
        for si in range(S):
            tok = src_ref[b, si]
            x_scr[pl.ds(b * S + si, 1), :] = f32v_ref[pl.ds(EMB_OFF + tok, 1), :]
    pe = f32v_ref[PE_OFF:PE_OFF + S, :]                          # (S, D) f32, static slice
    x = x_scr[...] + jnp.concatenate([pe] * B, axis=0)           # (B*S, D) f32

    # ---- post-LN transformer encoder layers (static unroll over L) ----
    for l in range(L):
        wqkv = wqkv_ref[l]                                       # (D, 3D)   bf16
        bqkv = bqkv_ref[l]                                       # (1, 3D)   f32
        wow2 = wow2_ref[l]                                       # (D+FF, D) bf16
        wo, w2 = wow2[0:D, :], wow2[D:D + FF, :]
        w1 = w1_ref[l]                                           # (D, FF)   bf16
        b1 = b1_ref[l]                                           # (1, FF)   f32
        vec = f32v_ref[l * VEC_ROWS:(l + 1) * VEC_ROWS, :]       # (8, D)    f32
        bo, g1, be1, b2, g2, be2 = (vec[i:i + 1, :] for i in range(6))

        # --- QKV projection: ONE lane-dense matmul for the whole (batch*seq) slab ---
        qkv = jnp.dot(x.astype(jnp.bfloat16), wqkv,
                      preferred_element_type=jnp.float32) + bqkv           # (B*S, 3D) f32

        # --- attention core, batched over a single leading (B*H) dim ---
        def blocks(base):
            return jnp.stack(
                [qkv[b * S:(b + 1) * S, base + h * HD: base + (h + 1) * HD]
                 for b in range(B) for h in range(H)], axis=0)             # (B*H, S, HD)
        q, k, v = blocks(0), blocks(D), blocks(2 * D)

        sc = jnp.einsum("zqf,zkf->zqk", q, k,
                        preferred_element_type=jnp.float32) * scale        # (B*H, S, S)
        sc = sc - jnp.max(sc, axis=-1, keepdims=True)
        p = jnp.exp(sc)
        p = p * pl.reciprocal(jnp.sum(p, axis=-1, keepdims=True), approx=True)
        o = jnp.einsum("zqk,zkf->zqf", p, v,
                       preferred_element_type=jnp.float32)                 # (B*H, S, HD)
        o = jnp.concatenate(
            [jnp.concatenate([o[b * H + h] for h in range(H)], axis=-1)    # heads -> lanes
             for b in range(B)], axis=0)                                   # (B*S, D)

        # --- output projection: one (B*S,D)@(D,D) matmul (no per-head einsum + sum) ---
        attn = jnp.dot(o.astype(jnp.bfloat16), wo,
                       preferred_element_type=jnp.float32) + bo            # (B*S, D)

        # --- residual + LayerNorm1 (post-norm) ---
        y = layer_norm(x + attn, g1, be1)

        # --- feed-forward: Linear -> ReLU -> Linear (batch-merged) ---
        hmid = jnp.maximum(
            jnp.dot(y.astype(jnp.bfloat16), w1,
                    preferred_element_type=jnp.float32) + b1, 0.0)         # (B*S, FF)
        ffn = jnp.dot(hmid.astype(jnp.bfloat16), w2,
                      preferred_element_type=jnp.float32) + b2             # (B*S, D)

        # --- residual + LayerNorm2 ---
        x = layer_norm(y + ffn, g2, be2)

    # ---- last sequence position of every batch element -> fc_out, in-kernel ----
    last = jnp.concatenate([x[b * S + S - 1: b * S + S, :] for b in range(B)], axis=0)  # (B, D)
    out_ref[...] = (jnp.dot(last.astype(jnp.bfloat16), fcw_ref[...],
                            preferred_element_type=jnp.float32) + fcb_ref[...])


# ----------------------------------------------------------------------------------------
# parameter init, packing, positional encoding, forward
# ----------------------------------------------------------------------------------------
def positional_encoding(d_model, max_len=MAX_LEN):
    position = jnp.arange(max_len, dtype=jnp.float32)[:, None]
    div_term = jnp.exp(jnp.arange(0, d_model, 2, dtype=jnp.float32)
                       * (-jnp.log(10000.0) / d_model))
    pe = jnp.zeros((max_len, d_model), dtype=jnp.float32)
    pe = pe.at[:, 0::2].set(jnp.sin(position * div_term))
    pe = pe.at[:, 1::2].set(jnp.cos(position * div_term))
    return pe


def init_params(key):
    """Weights in (in, out) layout so y = x @ W + b matches torch's x @ W.T + b."""
    def dense(k, n_in, n_out, scale=0.02):
        return scale * jax.random.normal(k, (n_in, n_out), dtype=jnp.float32)

    keys = jax.random.split(key, 2 + NUM_LAYERS)
    layers = []
    for l in range(NUM_LAYERS):
        lk = jax.random.split(keys[2 + l], 6)
        layers.append(dict(
            wq=dense(lk[0], D_MODEL, D_MODEL), bq=jnp.zeros((D_MODEL,), jnp.float32),
            wk=dense(lk[1], D_MODEL, D_MODEL), bk=jnp.zeros((D_MODEL,), jnp.float32),
            wv=dense(lk[2], D_MODEL, D_MODEL), bv=jnp.zeros((D_MODEL,), jnp.float32),
            wo=dense(lk[3], D_MODEL, D_MODEL), bo=jnp.zeros((D_MODEL,), jnp.float32),
            g1=jnp.ones((D_MODEL,), jnp.float32), be1=jnp.zeros((D_MODEL,), jnp.float32),
            w1=dense(lk[4], D_MODEL, DIM_FF), b1=jnp.zeros((DIM_FF,), jnp.float32),
            w2=dense(lk[5], DIM_FF, D_MODEL), b2=jnp.zeros((D_MODEL,), jnp.float32),
            g2=jnp.ones((D_MODEL,), jnp.float32), be2=jnp.zeros((D_MODEL,), jnp.float32),
        ))
    return dict(
        embedding=0.02 * jax.random.normal(keys[0], (VOCAB, D_MODEL), jnp.float32),
        fc_w=dense(keys[1], D_MODEL, VOCAB),
        fc_b=jnp.zeros((VOCAB,), jnp.float32),
        layers=layers,
    )


def pack_params(params):
    """Pack weights into a handful of layer-stacked slabs (done once at init)."""
    bf16 = jnp.bfloat16
    lyrs = params["layers"]
    wqkv = jnp.stack([jnp.concatenate([lp["wq"], lp["wk"], lp["wv"]], axis=1)
                      for lp in lyrs], 0)                                   # (L, D, 3D)
    bqkv = jnp.stack([jnp.concatenate([lp["bq"], lp["bk"], lp["bv"]], 0)[None, :]
                      for lp in lyrs], 0)                                   # (L, 1, 3D)
    wow2 = jnp.stack([jnp.concatenate([lp["wo"], lp["w2"]], axis=0)
                      for lp in lyrs], 0)                                   # (L, D+FF, D)
    w1 = jnp.stack([lp["w1"] for lp in lyrs], 0)                            # (L, D, FF)
    b1 = jnp.stack([lp["b1"][None, :] for lp in lyrs], 0)                   # (L, 1, FF)
    zero = jnp.zeros((D_MODEL,), jnp.float32)
    vec = jnp.concatenate(
        [jnp.stack([lp["bo"], lp["g1"], lp["be1"], lp["b2"], lp["g2"], lp["be2"], zero, zero], 0)
         for lp in lyrs], axis=0)                                           # (L*8, D)
    f32v = jnp.concatenate([vec, params["embedding"],
                            positional_encoding(D_MODEL)[:SEQ]], axis=0)    # (L*8+V+S, D)
    return dict(
        wqkv=wqkv.astype(bf16),
        bqkv=bqkv,
        wow2=wow2.astype(bf16),
        w1=w1.astype(bf16),
        b1=b1,
        f32v=f32v,
        fc_w=params["fc_w"].astype(bf16),        # (D, V)
        fc_b=params["fc_b"][None, :],            # (1, V)
    )


def _full_spec(arr):
    nd = arr.ndim
    # index_map receives (grid index, scalar-prefetch ref) and always picks block (0, ..., 0)
    return pl.BlockSpec(arr.shape, lambda i, src_ref, _nd=nd: (0,) * _nd)


@jax.jit
def charformer_forward(src, packed):
    B, S = src.shape
    operands = (packed["wqkv"], packed["bqkv"], packed["wow2"], packed["w1"],
                packed["b1"], packed["f32v"], packed["fc_w"], packed["fc_b"])
    grid_spec = pltpu.PrefetchScalarGridSpec(
        num_scalar_prefetch=1,                       # src -> SMEM
        grid=(1,),
        in_specs=[_full_spec(a) for a in operands],
        out_specs=pl.BlockSpec((B, VOCAB), lambda i, src_ref: (0, 0)),
        scratch_shapes=[pltpu.VMEM((B * S, D_MODEL), jnp.float32)],
    )
    return pl.pallas_call(
        _charformer_kernel,
        grid_spec=grid_spec,
        out_shape=jax.ShapeDtypeStruct((B, VOCAB), jnp.float32),
        compiler_params=pltpu.CompilerParams(dimension_semantics=("arbitrary",)),
    )(src, *operands)


if __name__ == "__main__":
    key = jax.random.PRNGKey(0)
    pkey, dkey = jax.random.split(key)
    packed = pack_params(init_params(pkey))
    src = jax.random.randint(dkey, (BATCH, SEQ), 0, VOCAB, dtype=jnp.int32)

    out = charformer_forward(src, packed)
    out = jax.block_until_ready(out)
    assert out.shape == (BATCH, VOCAB), out.shape
    assert bool(jnp.all(jnp.isfinite(out)))
    print("KERNEL_OK")
</pallas_src>

<mosaic_0001>
module attributes {stable_mosaic.version = 11 : i64} {
  func.func @_charformer_kernel(%arg0: i32, %arg1: memref<2x8xi32, #tpu.memory_space<smem>>, %arg2: memref<2x32x96xbf16, #tpu.memory_space<vmem>>, %arg3: memref<2x1x96xf32, #tpu.memory_space<vmem>>, %arg4: memref<2x96x32xbf16, #tpu.memory_space<vmem>>, %arg5: memref<2x32x64xbf16, #tpu.memory_space<vmem>>, %arg6: memref<2x1x64xf32, #tpu.memory_space<vmem>>, %arg7: memref<40x32xf32, #tpu.memory_space<vmem>>, %arg8: memref<32x16xbf16, #tpu.memory_space<vmem>>, %arg9: memref<1x16xf32, #tpu.memory_space<vmem>>, %arg10: memref<2x16xf32, #tpu.memory_space<vmem>>, %arg11: memref<16x32xf32, #tpu.memory_space<vmem>>) attributes {dimension_semantics = [#tpu.dimension_semantics<arbitrary>], iteration_bounds = array<i64: 1>, scalar_prefetch = 1 : i64, scratch_operands = 1 : i64, tpu.core_type = #tpu.core_type<tc>, window_params = [{pipeline_mode = #tpu.pipeline_mode<synchronous>, transform_indices = @transform_0, window_bounds = array<i64: 2, 32, 96>}, {pipeline_mode = #tpu.pipeline_mode<synchronous>, transform_indices = @transform_1, window_bounds = array<i64: 2, 1, 96>}, {pipeline_mode = #tpu.pipeline_mode<synchronous>, transform_indices = @transform_2, window_bounds = array<i64: 2, 96, 32>}, {pipeline_mode = #tpu.pipeline_mode<synchronous>, transform_indices = @transform_3, window_bounds = array<i64: 2, 32, 64>}, {pipeline_mode = #tpu.pipeline_mode<synchronous>, transform_indices = @transform_4, window_bounds = array<i64: 2, 1, 64>}, {pipeline_mode = #tpu.pipeline_mode<synchronous>, transform_indices = @transform_5, window_bounds = array<i64: 40, 32>}, {pipeline_mode = #tpu.pipeline_mode<synchronous>, transform_indices = @transform_6, window_bounds = array<i64: 32, 16>}, {pipeline_mode = #tpu.pipeline_mode<synchronous>, transform_indices = @transform_7, window_bounds = array<i64: 1, 16>}, {pipeline_mode = #tpu.pipeline_mode<synchronous>, transform_indices = @transform_8, window_bounds = array<i64: 2, 16>}]} {
    %c0 = arith.constant 0 : index
    %c0_0 = arith.constant 0 : index
    %0 = memref.load %arg1[%c0, %c0_0] : memref<2x8xi32, #tpu.memory_space<smem>>
    %c16_i32 = arith.constant 16 : i32
    %1 = arith.addi %c16_i32, %0 : i32
    %2 = arith.index_cast %1 : i32 to index
    %c0_1 = arith.constant 0 : index
    %3 = vector.load %arg7[%2, %c0_1] : memref<40x32xf32, #tpu.memory_space<vmem>>, vector<1x32xf32>
    %c0_2 = arith.constant 0 : index
    %c0_3 = arith.constant 0 : index
    %4 = vector.load %arg11[%c0_2, %c0_3] : memref<16x32xf32, #tpu.memory_space<vmem>>, vector<1x32xf32>
    tpu.vector_store %arg11[%c0_2, %c0_3], %3 {strides = array<i32>} : memref<16x32xf32, #tpu.memory_space<vmem>>, vector<1x32xf32>,
    %c0_4 = arith.constant 0 : index
    %c1 = arith.constant 1 : index
    %5 = memref.load %arg1[%c0_4, %c1] : memref<2x8xi32, #tpu.memory_space<smem>>
    %c16_i32_5 = arith.constant 16 : i32
    %6 = arith.addi %c16_i32_5, %5 : i32
    %7 = arith.index_cast %6 : i32 to index
    %c0_6 = arith.constant 0 : index
    %8 = vector.load %arg7[%7, %c0_6] : memref<40x32xf32, #tpu.memory_space<vmem>>, vector<1x32xf32>
    %c1_7 = arith.constant 1 : index
    %c0_8 = arith.constant 0 : index
    %9 = vector.load %arg11[%c1_7, %c0_8] : memref<16x32xf32, #tpu.memory_space<vmem>>, vector<1x32xf32>
    tpu.vector_store %arg11[%c1_7, %c0_8], %8 {strides = array<i32>} : memref<16x32xf32, #tpu.memory_space<vmem>>, vector<1x32xf32>,
    %c0_9 = arith.constant 0 : index
    %c2 = arith.constant 2 : index
    %10 = memref.load %arg1[%c0_9, %c2] : memref<2x8xi32, #tpu.memory_space<smem>>
    %c16_i32_10 = arith.constant 16 : i32
    %11 = arith.addi %c16_i32_10, %10 : i32
    %12 = arith.index_cast %11 : i32 to index
    %c0_11 = arith.constant 0 : index
    %13 = vector.load %arg7[%12, %c0_11] : memref<40x32xf32, #tpu.memory_space<vmem>>, vector<1x32xf32>
    %c2_12 = arith.constant 2 : index
    %c0_13 = arith.constant 0 : index
    %14 = vector.load %arg11[%c2_12, %c0_13] : memref<16x32xf32, #tpu.memory_space<vmem>>, vector<1x32xf32>
    tpu.vector_store %arg11[%c2_12, %c0_13], %13 {strides = array<i32>} : memref<16x32xf32, #tpu.memory_space<vmem>>, vector<1x32xf32>,
    %c0_14 = arith.constant 0 : index
    %c3 = arith.constant 3 : index
    %15 = memref.load %arg1[%c0_14, %c3] : memref<2x8xi32, #tpu.memory_space<smem>>
    %c16_i32_15 = arith.constant 16 : i32
    %16 = arith.addi %c16_i32_15, %15 : i32
    %17 = arith.index_cast %16 : i32 to index
    %c0_16 = arith.constant 0 : index
    %18 = vector.load %arg7[%17, %c0_16] : memref<40x32xf32, #tpu.memory_space<vmem>>, vector<1x32xf32>
    %c3_17 = arith.constant 3 : index
    %c0_18 = arith.constant 0 : index
    %19 = vector.load %arg11[%c3_17, %c0_18] : memref<16x32xf32, #tpu.memory_space<vmem>>, vector<1x32xf32>
    tpu.vector_store %arg11[%c3_17, %c0_18], %18 {strides = array<i32>} : memref<16x32xf32, #tpu.memory_space<vmem>>, vector<1x32xf32>,
    %c0_19 = arith.constant 0 : index
    %c4 = arith.constant 4 : index
    %20 = memref.load %arg1[%c0_19, %c4] : memref<2x8xi32, #tpu.memory_space<smem>>
    %c16_i32_20 = arith.constant 16 : i32
    %21 = arith.addi %c16_i32_20, %20 : i32
    %22 = arith.index_cast %21 : i32 to index
    %c0_21 = arith.constant 0 : index
    %23 = vector.load %arg7[%22, %c0_21] : memref<40x32xf32, #tpu.memory_space<vmem>>, vector<1x32xf32>
    %c4_22 = arith.constant 4 : index
    %c0_23 = arith.constant 0 : index
    %24 = vector.load %arg11[%c4_22, %c0_23] : memref<16x32xf32, #tpu.memory_space<vmem>>, vector<1x32xf32>
    tpu.vector_store %arg11[%c4_22, %c0_23], %23 {strides = array<i32>} : memref<16x32xf32, #tpu.memory_space<vmem>>, vector<1x32xf32>,
    %c0_24 = arith.constant 0 : index
    %c5 = arith.constant 5 : index
    %25 = memref.load %arg1[%c0_24, %c5] : memref<2x8xi32, #tpu.memory_space<smem>>
    %c16_i32_25 = arith.constant 16 : i32
    %26 = arith.addi %c16_i32_25, %25 : i32
    %27 = arith.index_cast %26 : i32 to index
    %c0_26 = arith.constant 0 : index
    %28 = vector.load %arg7[%27, %c0_26] : memref<40x32xf32, #tpu.memory_space<vmem>>, vector<1x32xf32>
    %c5_27 = arith.constant 5 : index
    %c0_28 = arith.constant 0 : index
    %29 = vector.load %arg11[%c5_27, %c0_28] : memref<16x32xf32, #tpu.memory_space<vmem>>, vector<1x32xf32>
    tpu.vector_store %arg11[%c5_27, %c0_28], %28 {strides = array<i32>} : memref<16x32xf32, #tpu.memory_space<vmem>>, vector<1x32xf32>,
    %c0_29 = arith.constant 0 : index
    %c6 = arith.constant 6 : index
    %30 = memref.load %arg1[%c0_29, %c6] : memref<2x8xi32, #tpu.memory_space<smem>>
    %c16_i32_30 = arith.constant 16 : i32
    %31 = arith.addi %c16_i32_30, %30 : i32
    %32 = arith.index_cast %31 : i32 to index
    %c0_31 = arith.constant 0 : index
    %33 = vector.load %arg7[%32, %c0_31] : memref<40x32xf32, #tpu.memory_space<vmem>>, vector<1x32xf32>
    %c6_32 = arith.constant 6 : index
    %c0_33 = arith.constant 0 : index
    %34 = vector.load %arg11[%c6_32, %c0_33] : memref<16x32xf32, #tpu.memory_space<vmem>>, vector<1x32xf32>
    tpu.vector_store %arg11[%c6_32, %c0_33], %33 {strides = array<i32>} : memref<16x32xf32, #tpu.memory_space<vmem>>, vector<1x32xf32>,
    %c0_34 = arith.constant 0 : index
    %c7 = arith.constant 7 : index
    %35 = memref.load %arg1[%c0_34, %c7] : memref<2x8xi32, #tpu.memory_space<smem>>
    %c16_i32_35 = arith.constant 16 : i32
    %36 = arith.addi %c16_i32_35, %35 : i32
    %37 = arith.index_cast %36 : i32 to index
    %c0_36 = arith.constant 0 : index
    %38 = vector.load %arg7[%37, %c0_36] : memref<40x32xf32, #tpu.memory_space<vmem>>, vector<1x32xf32>
    %c7_37 = arith.constant 7 : index
    %c0_38 = arith.constant 0 : index
    %39 = vector.load %arg11[%c7_37, %c0_38] : memref<16x32xf32, #tpu.memory_space<vmem>>, vector<1x32xf32>
    tpu.vector_store %arg11[%c7_37, %c0_38], %38 {strides = array<i32>} : memref<16x32xf32, #tpu.memory_space<vmem>>, vector<1x32xf32>,
    %c1_39 = arith.constant 1 : index
    %c0_40 = arith.constant 0 : index
    %40 = memref.load %arg1[%c1_39, %c0_40] : memref<2x8xi32, #tpu.memory_space<smem>>
    %c16_i32_41 = arith.constant 16 : i32
    %41 = arith.addi %c16_i32_41, %40 : i32
    %42 = arith.index_cast %41 : i32 to index
    %c0_42 = arith.constant 0 : index
    %43 = vector.load %arg7[%42, %c0_42] : memref<40x32xf32, #tpu.memory_space<vmem>>, vector<1x32xf32>
    %c8 = arith.constant 8 : index
    %c0_43 = arith.constant 0 : index
    %44 = vector.load %arg11[%c8, %c0_43] : memref<16x32xf32, #tpu.memory_space<vmem>>, vector<1x32xf32>
    tpu.vector_store %arg11[%c8, %c0_43], %43 {strides = array<i32>} : memref<16x32xf32, #tpu.memory_space<vmem>>, vector<1x32xf32>,
    %c1_44 = arith.constant 1 : index
    %c1_45 = arith.constant 1 : index
    %45 = memref.load %arg1[%c1_44, %c1_45] : memref<2x8xi32, #tpu.memory_space<smem>>
    %c16_i32_46 = arith.constant 16 : i32
    %46 = arith.addi %c16_i32_46, %45 : i32
    %47 = arith.index_cast %46 : i32 to index
    %c0_47 = arith.constant 0 : index
    %48 = vector.load %arg7[%47, %c0_47] : memref<40x32xf32, #tpu.memory_space<vmem>>, vector<1x32xf32>
    %c9 = arith.constant 9 : index
    %c0_48 = arith.constant 0 : index
    %49 = vector.load %arg11[%c9, %c0_48] : memref<16x32xf32, #tpu.memory_space<vmem>>, vector<1x32xf32>
    tpu.vector_store %arg11[%c9, %c0_48], %48 {strides = array<i32>} : memref<16x32xf32, #tpu.memory_space<vmem>>, vector<1x32xf32>,
    %c1_49 = arith.constant 1 : index
    %c2_50 = arith.constant 2 : index
    %50 = memref.load %arg1[%c1_49, %c2_50] : memref<2x8xi32, #tpu.memory_space<smem>>
    %c16_i32_51 = arith.constant 16 : i32
    %51 = arith.addi %c16_i32_51, %50 : i32
    %52 = arith.index_cast %51 : i32 to index
    %c0_52 = arith.constant 0 : index
    %53 = vector.load %arg7[%52, %c0_52] : memref<40x32xf32, #tpu.memory_space<vmem>>, vector<1x32xf32>
    %c10 = arith.constant 10 : index
    %c0_53 = arith.constant 0 : index
    %54 = vector.load %arg11[%c10, %c0_53] : memref<16x32xf32, #tpu.memory_space<vmem>>, vector<1x32xf32>
    tpu.vector_store %arg11[%c10, %c0_53], %53 {strides = array<i32>} : memref<16x32xf32, #tpu.memory_space<vmem>>, vector<1x32xf32>,
    %c1_54 = arith.constant 1 : index
    %c3_55 = arith.constant 3 : index
    %55 = memref.load %arg1[%c1_54, %c3_55] : memref<2x8xi32, #tpu.memory_space<smem>>
    %c16_i32_56 = arith.constant 16 : i32
    %56 = arith.addi %c16_i32_56, %55 : i32
    %57 = arith.index_cast %56 : i32 to index
    %c0_57 = arith.constant 0 : index
    %58 = vector.load %arg7[%57, %c0_57] : memref<40x32xf32, #tpu.memory_space<vmem>>, vector<1x32xf32>
    %c11 = arith.constant 11 : index
    %c0_58 = arith.constant 0 : index
    %59 = vector.load %arg11[%c11, %c0_58] : memref<16x32xf32, #tpu.memory_space<vmem>>, vector<1x32xf32>
    tpu.vector_store %arg11[%c11, %c0_58], %58 {strides = array<i32>} : memref<16x32xf32, #tpu.memory_space<vmem>>, vector<1x32xf32>,
    %c1_59 = arith.constant 1 : index
    %c4_60 = arith.constant 4 : index
    %60 = memref.load %arg1[%c1_59, %c4_60] : memref<2x8xi32, #tpu.memory_space<smem>>
    %c16_i32_61 = arith.constant 16 : i32
    %61 = arith.addi %c16_i32_61, %60 : i32
    %62 = arith.index_cast %61 : i32 to index
    %c0_62 = arith.constant 0 : index
    %63 = vector.load %arg7[%62, %c0_62] : memref<40x32xf32, #tpu.memory_space<vmem>>, vector<1x32xf32>
    %c12 = arith.constant 12 : index
    %c0_63 = arith.constant 0 : index
    %64 = vector.load %arg11[%c12, %c0_63] : memref<16x32xf32, #tpu.memory_space<vmem>>, vector<1x32xf32>
    tpu.vector_store %arg11[%c12, %c0_63], %63 {strides = array<i32>} : memref<16x32xf32, #tpu.memory_space<vmem>>, vector<1x32xf32>,
    %c1_64 = arith.constant 1 : index
    %c5_65 = arith.constant 5 : index
    %65 = memref.load %arg1[%c1_64, %c5_65] : memref<2x8xi32, #tpu.memory_space<smem>>
    %c16_i32_66 = arith.constant 16 : i32
    %66 = arith.addi %c16_i32_66, %65 : i32
    %67 = arith.index_cast %66 : i32 to index
    %c0_67 = arith.constant 0 : index
    %68 = vector.load %arg7[%67, %c0_67] : memref<40x32xf32, #tpu.memory_space<vmem>>, vector<1x32xf32>
    %c13 = arith.constant 13 : index
    %c0_68 = arith.constant 0 : index
    %69 = vector.load %arg11[%c13, %c0_68] : memref<16x32xf32, #tpu.memory_space<vmem>>, vector<1x32xf32>
    tpu.vector_store %arg11[%c13, %c0_68], %68 {strides = array<i32>} : memref<16x32xf32, #tpu.memory_space<vmem>>, vector<1x32xf32>,
    %c1_69 = arith.constant 1 : index
    %c6_70 = arith.constant 6 : index
    %70 = memref.load %arg1[%c1_69, %c6_70] : memref<2x8xi32, #tpu.memory_space<smem>>
    %c16_i32_71 = arith.constant 16 : i32
    %71 = arith.addi %c16_i32_71, %70 : i32
    %72 = arith.index_cast %71 : i32 to index
    %c0_72 = arith.constant 0 : index
    %73 = vector.load %arg7[%72, %c0_72] : memref<40x32xf32, #tpu.memory_space<vmem>>, vector<1x32xf32>
    %c14 = arith.constant 14 : index
    %c0_73 = arith.constant 0 : index
    %74 = vector.load %arg11[%c14, %c0_73] : memref<16x32xf32, #tpu.memory_space<vmem>>, vector<1x32xf32>
    tpu.vector_store %arg11[%c14, %c0_73], %73 {strides = array<i32>} : memref<16x32xf32, #tpu.memory_space<vmem>>, vector<1x32xf32>,
    %c1_74 = arith.constant 1 : index
    %c7_75 = arith.constant 7 : index
    %75 = memref.load %arg1[%c1_74, %c7_75] : memref<2x8xi32, #tpu.memory_space<smem>>
    %c16_i32_76 = arith.constant 16 : i32
    %76 = arith.addi %c16_i32_76, %75 : i32
    %77 = arith.index_cast %76 : i32 to index
    %c0_77 = arith.constant 0 : index
    %78 = vector.load %arg7[%77, %c0_77] : memref<40x32xf32, #tpu.memory_space<vmem>>, vector<1x32xf32>
    %c15 = arith.constant 15 : index
    %c0_78 = arith.constant 0 : index
    %79 = vector.load %arg11[%c15, %c0_78] : memref<16x32xf32, #tpu.memory_space<vmem>>, vector<1x32xf32>
    tpu.vector_store %arg11[%c15, %c0_78], %78 {strides = array<i32>} : memref<16x32xf32, #tpu.memory_space<vmem>>, vector<1x32xf32>,
    %c32 = arith.constant 32 : index
    %c0_79 = arith.constant 0 : index
    %80 = vector.load %arg7[%c32, %c0_79] : memref<40x32xf32, #tpu.memory_space<vmem>>, vector<8x32xf32>
    %c0_80 = arith.constant 0 : index
    %c0_81 = arith.constant 0 : index
    %81 = vector.load %arg11[%c0_80, %c0_81] : memref<16x32xf32, #tpu.memory_space<vmem>>, vector<16x32xf32>
    %82 = tpu.concatenate %80, %80 in 0 : vector<8x32xf32>, vector<8x32xf32> -> vector<16x32xf32>
    %83 = arith.addf %81, %82 : vector<16x32xf32>
    %c0_82 = arith.constant 0 : index
    %c0_83 = arith.constant 0 : index
    %c0_84 = arith.constant 0 : index
    %84 = vector.load %arg2[%c0_82, %c0_83, %c0_84] : memref<2x32x96xbf16, #tpu.memory_space<vmem>>, vector<1x32x96xbf16>
    %85 = vector.shape_cast %84 : vector<1x32x96xbf16> to vector<32x96xbf16>
    %c0_85 = arith.constant 0 : index
    %c0_86 = arith.constant 0 : index
    %c0_87 = arith.constant 0 : index
    %86 = vector.load %arg3[%c0_85, %c0_86, %c0_87] : memref<2x1x96xf32, #tpu.memory_space<vmem>>, vector<1x1x96xf32>
    %87 = vector.shape_cast %86 : vector<1x1x96xf32> to vector<1x96xf32>
    %c0_88 = arith.constant 0 : index
    %c0_89 = arith.constant 0 : index
    %c0_90 = arith.constant 0 : index
    %88 = vector.load %arg4[%c0_88, %c0_89, %c0_90] : memref<2x96x32xbf16, #tpu.memory_space<vmem>>, vector<1x96x32xbf16>
    %89 = vector.shape_cast %88 : vector<1x96x32xbf16> to vector<96x32xbf16>
    %90 = vector.extract_strided_slice %89 {offsets = [0, 0], sizes = [32, 32], strides = [1, 1]} : vector<96x32xbf16> to vector<32x32xbf16>
    %91 = vector.extract_strided_slice %89 {offsets = [32, 0], sizes = [64, 32], strides = [1, 1]} : vector<96x32xbf16> to vector<64x32xbf16>
    %c0_91 = arith.constant 0 : index
    %c0_92 = arith.constant 0 : index
    %c0_93 = arith.constant 0 : index
    %92 = vector.load %arg5[%c0_91, %c0_92, %c0_93] : memref<2x32x64xbf16, #tpu.memory_space<vmem>>, vector<1x32x64xbf16>
    %93 = vector.shape_cast %92 : vector<1x32x64xbf16> to vector<32x64xbf16>
    %c0_94 = arith.constant 0 : index
    %c0_95 = arith.constant 0 : index
    %c0_96 = arith.constant 0 : index
    %94 = vector.load %arg6[%c0_94, %c0_95, %c0_96] : memref<2x1x64xf32, #tpu.memory_space<vmem>>, vector<1x1x64xf32>
    %95 = vector.shape_cast %94 : vector<1x1x64xf32> to vector<1x64xf32>
    %c0_97 = arith.constant 0 : index
    %c0_98 = arith.constant 0 : index
    %96 = vector.load %arg7[%c0_97, %c0_98] : memref<40x32xf32, #tpu.memory_space<vmem>>, vector<8x32xf32>
    %97 = vector.extract_strided_slice %96 {offsets = [0, 0], sizes = [1, 32], strides = [1, 1]} : vector<8x32xf32> to vector<1x32xf32>
    %98 = vector.extract_strided_slice %96 {offsets = [1, 0], sizes = [1, 32], strides = [1, 1]} : vector<8x32xf32> to vector<1x32xf32>
    %99 = vector.extract_strided_slice %96 {offsets = [2, 0], sizes = [1, 32], strides = [1, 1]} : vector<8x32xf32> to vector<1x32xf32>
    %100 = vector.extract_strided_slice %96 {offsets = [3, 0], sizes = [1, 32], strides = [1, 1]} : vector<8x32xf32> to vector<1x32xf32>
    %101 = vector.extract_strided_slice %96 {offsets = [4, 0], sizes = [1, 32], strides = [1, 1]} : vector<8x32xf32> to vector<1x32xf32>
    %102 = vector.extract_strided_slice %96 {offsets = [5, 0], sizes = [1, 32], strides = [1, 1]} : vector<8x32xf32> to vector<1x32xf32>
    %103 = arith.truncf %83 : vector<16x32xf32> to vector<16x32xbf16>
    %cst = arith.constant dense<0.000000e+00> : vector<16x96xf32>
    %104 = tpu.matmul %103, %85, %cst {dimension_numbers = #tpu.dot_dimension_numbers<[1], [0], [0], [1], [0, 0, 1, 1], [], []>} : vector<16x32xbf16>, vector<32x96xbf16>, vector<16x96xf32> -> vector<16x96xf32>
    %105 = vector.broadcast %87 : vector<1x96xf32> to vector<16x96xf32>
    %106 = arith.addf %104, %105 : vector<16x96xf32>
    %107 = vector.extract_strided_slice %106 {offsets = [0, 0], sizes = [8, 8], strides = [1, 1]} : vector<16x96xf32> to vector<8x8xf32>
    %108 = vector.extract_strided_slice %106 {offsets = [0, 8], sizes = [8, 8], strides = [1, 1]} : vector<16x96xf32> to vector<8x8xf32>
    %109 = vector.extract_strided_slice %106 {offsets = [0, 16], sizes = [8, 8], strides = [1, 1]} : vector<16x96xf32> to vector<8x8xf32>
    %110 = vector.extract_strided_slice %106 {offsets = [0, 24], sizes = [8, 8], strides = [1, 1]} : vector<16x96xf32> to vector<8x8xf32>
    %111 = vector.extract_strided_slice %106 {offsets = [8, 0], sizes = [8, 8], strides = [1, 1]} : vector<16x96xf32> to vector<8x8xf32>
    %112 = vector.extract_strided_slice %106 {offsets = [8, 8], sizes = [8, 8], strides = [1, 1]} : vector<16x96xf32> to vector<8x8xf32>
    %113 = vector.extract_strided_slice %106 {offsets = [8, 16], sizes = [8, 8], strides = [1, 1]} : vector<16x96xf32> to vector<8x8xf32>
    %114 = vector.extract_strided_slice %106 {offsets = [8, 24], sizes = [8, 8], strides = [1, 1]} : vector<16x96xf32> to vector<8x8xf32>
    %115 = vector.shape_cast %107 : vector<8x8xf32> to vector<1x8x8xf32>
    %116 = vector.shape_cast %108 : vector<8x8xf32> to vector<1x8x8xf32>
    %117 = vector.shape_cast %109 : vector<8x8xf32> to vector<1x8x8xf32>
    %118 = vector.shape_cast %110 : vector<8x8xf32> to vector<1x8x8xf32>
    %119 = vector.shape_cast %111 : vector<8x8xf32> to vector<1x8x8xf32>
    %120 = vector.shape_cast %112 : vector<8x8xf32> to vector<1x8x8xf32>
    %121 = vector.shape_cast %113 : vector<8x8xf32> to vector<1x8x8xf32>
    %122 = vector.shape_cast %114 : vector<8x8xf32> to vector<1x8x8xf32>
    %123 = tpu.concatenate %115, %116, %117, %118, %119, %120, %121, %122 in 0 : vector<1x8x8xf32>, vector<1x8x8xf32>, vector<1x8x8xf32>, vector<1x8x8xf32>, vector<1x8x8xf32>, vector<1x8x8xf32>, vector<1x8x8xf32>, vector<1x8x8xf32> -> vector<8x8x8xf32>
    %124 = vector.extract_strided_slice %106 {offsets = [0, 32], sizes = [8, 8], strides = [1, 1]} : vector<16x96xf32> to vector<8x8xf32>
    %125 = vector.extract_strided_slice %106 {offsets = [0, 40], sizes = [8, 8], strides = [1, 1]} : vector<16x96xf32> to vector<8x8xf32>
    %126 = vector.extract_strided_slice %106 {offsets = [0, 48], sizes = [8, 8], strides = [1, 1]} : vector<16x96xf32> to vector<8x8xf32>
    %127 = vector.extract_strided_slice %106 {offsets = [0, 56], sizes = [8, 8], strides = [1, 1]} : vector<16x96xf32> to vector<8x8xf32>
    %128 = vector.extract_strided_slice %106 {offsets = [8, 32], sizes = [8, 8], strides = [1, 1]} : vector<16x96xf32> to vector<8x8xf32>
    %129 = vector.extract_strided_slice %106 {offsets = [8, 40], sizes = [8, 8], strides = [1, 1]} : vector<16x96xf32> to vector<8x8xf32>
    %130 = vector.extract_strided_slice %106 {offsets = [8, 48], sizes = [8, 8], strides = [1, 1]} : vector<16x96xf32> to vector<8x8xf32>
    %131 = vector.extract_strided_slice %106 {offsets = [8, 56], sizes = [8, 8], strides = [1, 1]} : vector<16x96xf32> to vector<8x8xf32>
    %132 = vector.shape_cast %124 : vector<8x8xf32> to vector<1x8x8xf32>
    %133 = vector.shape_cast %125 : vector<8x8xf32> to vector<1x8x8xf32>
    %134 = vector.shape_cast %126 : vector<8x8xf32> to vector<1x8x8xf32>
    %135 = vector.shape_cast %127 : vector<8x8xf32> to vector<1x8x8xf32>
    %136 = vector.shape_cast %128 : vector<8x8xf32> to vector<1x8x8xf32>
    %137 = vector.shape_cast %129 : vector<8x8xf32> to vector<1x8x8xf32>
    %138 = vector.shape_cast %130 : vector<8x8xf32> to vector<1x8x8xf32>
    %139 = vector.shape_cast %131 : vector<8x8xf32> to vector<1x8x8xf32>
    %140 = tpu.concatenate %132, %133, %134, %135, %136, %137, %138, %139 in 0 : vector<1x8x8xf32>, vector<1x8x8xf32>, vector<1x8x8xf32>, vector<1x8x8xf32>, vector<1x8x8xf32>, vector<1x8x8xf32>, vector<1x8x8xf32>, vector<1x8x8xf32> -> vector<8x8x8xf32>
    %141 = vector.extract_strided_slice %106 {offsets = [0, 64], sizes = [8, 8], strides = [1, 1]} : vector<16x96xf32> to vector<8x8xf32>
    %142 = vector.extract_strided_slice %106 {offsets = [0, 72], sizes = [8, 8], strides = [1, 1]} : vector<16x96xf32> to vector<8x8xf32>
    %143 = vector.extract_strided_slice %106 {offsets = [0, 80], sizes = [8, 8], strides = [1, 1]} : vector<16x96xf32> to vector<8x8xf32>
    %144 = vector.extract_strided_slice %106 {offsets = [0, 88], sizes = [8, 8], strides = [1, 1]} : vector<16x96xf32> to vector<8x8xf32>
    %145 = vector.extract_strided_slice %106 {offsets = [8, 64], sizes = [8, 8], strides = [1, 1]} : vector<16x96xf32> to vector<8x8xf32>
    %146 = vector.extract_strided_slice %106 {offsets = [8, 72], sizes = [8, 8], strides = [1, 1]} : vector<16x96xf32> to vector<8x8xf32>
    %147 = vector.extract_strided_slice %106 {offsets = [8, 80], sizes = [8, 8], strides = [1, 1]} : vector<16x96xf32> to vector<8x8xf32>
    %148 = vector.extract_strided_slice %106 {offsets = [8, 88], sizes = [8, 8], strides = [1, 1]} : vector<16x96xf32> to vector<8x8xf32>
    %149 = vector.shape_cast %141 : vector<8x8xf32> to vector<1x8x8xf32>
    %150 = vector.shape_cast %142 : vector<8x8xf32> to vector<1x8x8xf32>
    %151 = vector.shape_cast %143 : vector<8x8xf32> to vector<1x8x8xf32>
    %152 = vector.shape_cast %144 : vector<8x8xf32> to vector<1x8x8xf32>
    %153 = vector.shape_cast %145 : vector<8x8xf32> to vector<1x8x8xf32>
    %154 = vector.shape_cast %146 : vector<8x8xf32> to vector<1x8x8xf32>
    %155 = vector.shape_cast %147 : vector<8x8xf32> to vector<1x8x8xf32>
    %156 = vector.shape_cast %148 : vector<8x8xf32> to vector<1x8x8xf32>
    %157 = tpu.concatenate %149, %150, %151, %152, %153, %154, %155, %156 in 0 : vector<1x8x8xf32>, vector<1x8x8xf32>, vector<1x8x8xf32>, vector<1x8x8xf32>, vector<1x8x8xf32>, vector<1x8x8xf32>, vector<1x8x8xf32>, vector<1x8x8xf32> -> vector<8x8x8xf32>
    "tpu.trace_start"() <{level = 10 : i32, message = "zqf,zkf->zqk"}> : () -> ()
    %cst_99 = arith.constant dense<0.000000e+00> : vector<8x8x8xf32>
    %158 = tpu.matmul %123, %140, %cst_99 {dimension_numbers = #tpu.dot_dimension_numbers<[2], [2], [1], [1], [0, 0, 0, 1, 1, 1], [0], [0]>} : vector<8x8x8xf32>, vector<8x8x8xf32>, vector<8x8x8xf32> -> vector<8x8x8xf32>
    "tpu.trace_stop"() : () -> ()
    %cst_100 = arith.constant 0.353553385 : f32
    %159 = vector.broadcast %cst_100 : f32 to vector<8x8x8xf32>
    %160 = arith.mulf %158, %159 : vector<8x8x8xf32>
    %cst_101 = arith.constant dense<0xFF800000> : vector<8x8xf32>
    %161 = vector.multi_reduction <maximumf>, %160, %cst_101 [2] : vector<8x8x8xf32> to vector<8x8xf32>
    %162 = vector.shape_cast %161 : vector<8x8xf32> to vector<8x8x1xf32>
    %163 = vector.broadcast %162 : vector<8x8x1xf32> to vector<8x8x8xf32>
    %164 = arith.subf %160, %163 : vector<8x8x8xf32>
    %165 = math.exp %164 : vector<8x8x8xf32>
    %cst_102 = arith.constant dense<0.000000e+00> : vector<8x8xf32>
    %166 = vector.multi_reduction <add>, %165, %cst_102 [2] : vector<8x8x8xf32> to vector<8x8xf32>
    %167 = vector.shape_cast %166 : vector<8x8xf32> to vector<8x8x1xf32>
    %168 = tpu.reciprocal %167 {approx = true} : vector<8x8x1xf32> -> vector<8x8x1xf32>
    %169 = vector.broadcast %168 : vector<8x8x1xf32> to vector<8x8x8xf32>
    %170 = arith.mulf %165, %169 : vector<8x8x8xf32>
    "tpu.trace_start"() <{level = 10 : i32, message = "zqk,zkf->zqf"}> : () -> ()
    %cst_103 = arith.constant dense<0.000000e+00> : vector<8x8x8xf32>
    %171 = tpu.matmul %170, %157, %cst_103 {dimension_numbers = #tpu.dot_dimension_numbers<[2], [1], [1], [2], [0, 0, 0, 1, 1, 2], [0], [0]>} : vector<8x8x8xf32>, vector<8x8x8xf32>, vector<8x8x8xf32> -> vector<8x8x8xf32>
    "tpu.trace_stop"() : () -> ()
    %172 = vector.extract_strided_slice %171 {offsets = [0, 0, 0], sizes = [1, 8, 8], strides = [1, 1, 1]} : vector<8x8x8xf32> to vector<1x8x8xf32>
    %173 = vector.shape_cast %172 : vector<1x8x8xf32> to vector<8x8xf32>
    %174 = vector.extract_strided_slice %171 {offsets = [1, 0, 0], sizes = [1, 8, 8], strides = [1, 1, 1]} : vector<8x8x8xf32> to vector<1x8x8xf32>
    %175 = vector.shape_cast %174 : vector<1x8x8xf32> to vector<8x8xf32>
    %176 = vector.extract_strided_slice %171 {offsets = [2, 0, 0], sizes = [1, 8, 8], strides = [1, 1, 1]} : vector<8x8x8xf32> to vector<1x8x8xf32>
    %177 = vector.shape_cast %176 : vector<1x8x8xf32> to vector<8x8xf32>
    %178 = vector.extract_strided_slice %171 {offsets = [3, 0, 0], sizes = [1, 8, 8], strides = [1, 1, 1]} : vector<8x8x8xf32> to vector<1x8x8xf32>
    %179 = vector.shape_cast %178 : vector<1x8x8xf32> to vector<8x8xf32>
    %180 = tpu.concatenate %173, %175, %177, %179 in 1 : vector<8x8xf32>, vector<8x8xf32>, vector<8x8xf32>, vector<8x8xf32> -> vector<8x32xf32>
    %181 = vector.extract_strided_slice %171 {offsets = [4, 0, 0], sizes = [1, 8, 8], strides = [1, 1, 1]} : vector<8x8x8xf32> to vector<1x8x8xf32>
    %182 = vector.shape_cast %181 : vector<1x8x8xf32> to vector<8x8xf32>
    %183 = vector.extract_strided_slice %171 {offsets = [5, 0, 0], sizes = [1, 8, 8], strides = [1, 1, 1]} : vector<8x8x8xf32> to vector<1x8x8xf32>
    %184 = vector.shape_cast %183 : vector<1x8x8xf32> to vector<8x8xf32>
    %185 = vector.extract_strided_slice %171 {offsets = [6, 0, 0], sizes = [1, 8, 8], strides = [1, 1, 1]} : vector<8x8x8xf32> to vector<1x8x8xf32>
    %186 = vector.shape_cast %185 : vector<1x8x8xf32> to vector<8x8xf32>
    %187 = vector.extract_strided_slice %171 {offsets = [7, 0, 0], sizes = [1, 8, 8], strides = [1, 1, 1]} : vector<8x8x8xf32> to vector<1x8x8xf32>
    %188 = vector.shape_cast %187 : vector<1x8x8xf32> to vector<8x8xf32>
    %189 = tpu.concatenate %182, %184, %186, %188 in 1 : vector<8x8xf32>, vector<8x8xf32>, vector<8x8xf32>, vector<8x8xf32> -> vector<8x32xf32>
    %190 = tpu.concatenate %180, %189 in 0 : vector<8x32xf32>, vector<8x32xf32> -> vector<16x32xf32>
    %191 = arith.truncf %190 : vector<16x32xf32> to vector<16x32xbf16>
    %cst_104 = arith.constant dense<0.000000e+00> : vector<16x32xf32>
    %192 = tpu.matmul %191, %90, %cst_104 {dimension_numbers = #tpu.dot_dimension_numbers<[1], [0], [0], [1], [0, 0, 1, 1], [], []>} : vector<16x32xbf16>, vector<32x32xbf16>, vector<16x32xf32> -> vector<16x32xf32>
    %193 = vector.broadcast %97 : vector<1x32xf32> to vector<16x32xf32>
    %194 = arith.addf %192, %193 : vector<16x32xf32>
    %195 = arith.addf %83, %194 : vector<16x32xf32>
    %cst_105 = arith.constant dense<0.000000e+00> : vector<16xf32>
    %196 = vector.multi_reduction <add>, %195, %cst_105 [1] : vector<16x32xf32> to vector<16xf32>
    %197 = vector.shape_cast %196 : vector<16xf32> to vector<16x1xf32>
    %cst_106 = arith.constant 3.200000e+01 : f32
    %198 = vector.broadcast %cst_106 : f32 to vector<16x1xf32>
    %199 = arith.divf %197, %198 : vector<16x1xf32>
    %200 = vector.broadcast %199 : vector<16x1xf32> to vector<16x32xf32>
    %201 = arith.subf %195, %200 : vector<16x32xf32>
    %202 = arith.mulf %201, %201 : vector<16x32xf32>
    %cst_107 = arith.constant dense<0.000000e+00> : vector<16xf32>
    %203 = vector.multi_reduction <add>, %202, %cst_107 [1] : vector<16x32xf32> to vector<16xf32>
    %204 = vector.shape_cast %203 : vector<16xf32> to vector<16x1xf32>
    %cst_108 = arith.constant 3.200000e+01 : f32
    %205 = vector.broadcast %cst_108 : f32 to vector<16x1xf32>
    %206 = arith.divf %204, %205 : vector<16x1xf32>
    %207 = vector.broadcast %199 : vector<16x1xf32> to vector<16x32xf32>
    %208 = arith.subf %195, %207 : vector<16x32xf32>
    %cst_109 = arith.constant 9.99999974E-6 : f32
    %209 = vector.broadcast %cst_109 : f32 to vector<16x1xf32>
    %210 = arith.addf %206, %209 : vector<16x1xf32>
    %211 = math.rsqrt %210 : vector<16x1xf32>
    %212 = vector.broadcast %211 : vector<16x1xf32> to vector<16x32xf32>
    %213 = arith.mulf %208, %212 : vector<16x32xf32>
    %214 = vector.broadcast %98 : vector<1x32xf32> to vector<16x32xf32>
    %215 = arith.mulf %213, %214 : vector<16x32xf32>
    %216 = vector.broadcast %99 : vector<1x32xf32> to vector<16x32xf32>
    %217 = arith.addf %215, %216 : vector<16x32xf32>
    %218 = arith.truncf %217 : vector<16x32xf32> to vector<16x32xbf16>
    %cst_110 = arith.constant dense<0.000000e+00> : vector<16x64xf32>
    %219 = tpu.matmul %218, %93, %cst_110 {dimension_numbers = #tpu.dot_dimension_numbers<[1], [0], [0], [1], [0, 0, 1, 1], [], []>} : vector<16x32xbf16>, vector<32x64xbf16>, vector<16x64xf32> -> vector<16x64xf32>
    %220 = vector.broadcast %95 : vector<1x64xf32> to vector<16x64xf32>
    %221 = arith.addf %219, %220 : vector<16x64xf32>
    %cst_111 = arith.constant 0.000000e+00 : f32
    %222 = vector.broadcast %cst_111 : f32 to vector<16x64xf32>
    %223 = arith.maximumf %221, %222 : vector<16x64xf32>
    %224 = arith.truncf %223 : vector<16x64xf32> to vector<16x64xbf16>
    %cst_112 = arith.constant dense<0.000000e+00> : vector<16x32xf32>
    %225 = tpu.matmul %224, %91, %cst_112 {dimension_numbers = #tpu.dot_dimension_numbers<[1], [0], [0], [1], [0, 0, 1, 1], [], []>} : vector<16x64xbf16>, vector<64x32xbf16>, vector<16x32xf32> -> vector<16x32xf32>
    %226 = vector.broadcast %100 : vector<1x32xf32> to vector<16x32xf32>
    %227 = arith.addf %225, %226 : vector<16x32xf32>
    %228 = arith.addf %217, %227 : vector<16x32xf32>
    %cst_113 = arith.constant dense<0.000000e+00> : vector<16xf32>
    %229 = vector.multi_reduction <add>, %228, %cst_113 [1] : vector<16x32xf32> to vector<16xf32>
    %230 = vector.shape_cast %229 : vector<16xf32> to vector<16x1xf32>
    %cst_114 = arith.constant 3.200000e+01 : f32
    %231 = vector.broadcast %cst_114 : f32 to vector<16x1xf32>
    %232 = arith.divf %230, %231 : vector<16x1xf32>
    %233 = vector.broadcast %232 : vector<16x1xf32> to vector<16x32xf32>
    %234 = arith.subf %228, %233 : vector<16x32xf32>
    %235 = arith.mulf %234, %234 : vector<16x32xf32>
    %cst_115 = arith.constant dense<0.000000e+00> : vector<16xf32>
    %236 = vector.multi_reduction <add>, %235, %cst_115 [1] : vector<16x32xf32> to vector<16xf32>
    %237 = vector.shape_cast %236 : vector<16xf32> to vector<16x1xf32>
    %cst_116 = arith.constant 3.200000e+01 : f32
    %238 = vector.broadcast %cst_116 : f32 to vector<16x1xf32>
    %239 = arith.divf %237, %238 : vector<16x1xf32>
    %240 = vector.broadcast %232 : vector<16x1xf32> to vector<16x32xf32>
    %241 = arith.subf %228, %240 : vector<16x32xf32>
    %cst_117 = arith.constant 9.99999974E-6 : f32
    %242 = vector.broadcast %cst_117 : f32 to vector<16x1xf32>
    %243 = arith.addf %239, %242 : vector<16x1xf32>
    %244 = math.rsqrt %243 : vector<16x1xf32>
    %245 = vector.broadcast %244 : vector<16x1xf32> to vector<16x32xf32>
    %246 = arith.mulf %241, %245 : vector<16x32xf32>
    %247 = vector.broadcast %101 : vector<1x32xf32> to vector<16x32xf32>
    %248 = arith.mulf %246, %247 : vector<16x32xf32>
    %249 = vector.broadcast %102 : vector<1x32xf32> to vector<16x32xf32>
    %250 = arith.addf %248, %249 : vector<16x32xf32>
    %c1_118 = arith.constant 1 : index
    %c0_119 = arith.constant 0 : index
    %c0_120 = arith.constant 0 : index
    %251 = vector.load %arg2[%c1_118, %c0_119, %c0_120] : memref<2x32x96xbf16, #tpu.memory_space<vmem>>, vector<1x32x96xbf16>
    %252 = vector.shape_cast %251 : vector<1x32x96xbf16> to vector<32x96xbf16>
    %c1_121 = arith.constant 1 : index
    %c0_122 = arith.constant 0 : index
    %c0_123 = arith.constant 0 : index
    %253 = vector.load %arg3[%c1_121, %c0_122, %c0_123] : memref<2x1x96xf32, #tpu.memory_space<vmem>>, vector<1x1x96xf32>
    %254 = vector.shape_cast %253 : vector<1x1x96xf32> to vector<1x96xf32>
    %c1_124 = arith.constant 1 : index
    %c0_125 = arith.constant 0 : index
    %c0_126 = arith.constant 0 : index
    %255 = vector.load %arg4[%c1_124, %c0_125, %c0_126] : memref<2x96x32xbf16, #tpu.memory_space<vmem>>, vector<1x96x32xbf16>
    %256 = vector.shape_cast %255 : vector<1x96x32xbf16> to vector<96x32xbf16>
    %257 = vector.extract_strided_slice %256 {offsets = [0, 0], sizes = [32, 32], strides = [1, 1]} : vector<96x32xbf16> to vector<32x32xbf16>
    %258 = vector.extract_strided_slice %256 {offsets = [32, 0], sizes = [64, 32], strides = [1, 1]} : vector<96x32xbf16> to vector<64x32xbf16>
    %c1_127 = arith.constant 1 : index
    %c0_128 = arith.constant 0 : index
    %c0_129 = arith.constant 0 : index
    %259 = vector.load %arg5[%c1_127, %c0_128, %c0_129] : memref<2x32x64xbf16, #tpu.memory_space<vmem>>, vector<1x32x64xbf16>
    %260 = vector.shape_cast %259 : vector<1x32x64xbf16> to vector<32x64xbf16>
    %c1_130 = arith.constant 1 : index
    %c0_131 = arith.constant 0 : index
    %c0_132 = arith.constant 0 : index
    %261 = vector.load %arg6[%c1_130, %c0_131, %c0_132] : memref<2x1x64xf32, #tpu.memory_space<vmem>>, vector<1x1x64xf32>
    %262 = vector.shape_cast %261 : vector<1x1x64xf32> to vector<1x64xf32>
    %c8_133 = arith.constant 8 : index
    %c0_134 = arith.constant 0 : index
    %263 = vector.load %arg7[%c8_133, %c0_134] : memref<40x32xf32, #tpu.memory_space<vmem>>, vector<8x32xf32>
    %264 = vector.extract_strided_slice %263 {offsets = [0, 0], sizes = [1, 32], strides = [1, 1]} : vector<8x32xf32> to vector<1x32xf32>
    %265 = vector.extract_strided_slice %263 {offsets = [1, 0], sizes = [1, 32], strides = [1, 1]} : vector<8x32xf32> to vector<1x32xf32>
    %266 = vector.extract_strided_slice %263 {offsets = [2, 0], sizes = [1, 32], strides = [1, 1]} : vector<8x32xf32> to vector<1x32xf32>
    %267 = vector.extract_strided_slice %263 {offsets = [3, 0], sizes = [1, 32], strides = [1, 1]} : vector<8x32xf32> to vector<1x32xf32>
    %268 = vector.extract_strided_slice %263 {offsets = [4, 0], sizes = [1, 32], strides = [1, 1]} : vector<8x32xf32> to vector<1x32xf32>
    %269 = vector.extract_strided_slice %263 {offsets = [5, 0], sizes = [1, 32], strides = [1, 1]} : vector<8x32xf32> to vector<1x32xf32>
    %270 = arith.truncf %250 : vector<16x32xf32> to vector<16x32xbf16>
    %cst_135 = arith.constant dense<0.000000e+00> : vector<16x96xf32>
    %271 = tpu.matmul %270, %252, %cst_135 {dimension_numbers = #tpu.dot_dimension_numbers<[1], [0], [0], [1], [0, 0, 1, 1], [], []>} : vector<16x32xbf16>, vector<32x96xbf16>, vector<16x96xf32> -> vector<16x96xf32>
    %272 = vector.broadcast %254 : vector<1x96xf32> to vector<16x96xf32>
    %273 = arith.addf %271, %272 : vector<16x96xf32>
    %274 = vector.extract_strided_slice %273 {offsets = [0, 0], sizes = [8, 8], strides = [1, 1]} : vector<16x96xf32> to vector<8x8xf32>
    %275 = vector.extract_strided_slice %273 {offsets = [0, 8], sizes = [8, 8], strides = [1, 1]} : vector<16x96xf32> to vector<8x8xf32>
    %276 = vector.extract_strided_slice %273 {offsets = [0, 16], sizes = [8, 8], strides = [1, 1]} : vector<16x96xf32> to vector<8x8xf32>
    %277 = vector.extract_strided_slice %273 {offsets = [0, 24], sizes = [8, 8], strides = [1, 1]} : vector<16x96xf32> to vector<8x8xf32>
    %278 = vector.extract_strided_slice %273 {offsets = [8, 0], sizes = [8, 8], strides = [1, 1]} : vector<16x96xf32> to vector<8x8xf32>
    %279 = vector.extract_strided_slice %273 {offsets = [8, 8], sizes = [8, 8], strides = [1, 1]} : vector<16x96xf32> to vector<8x8xf32>
    %280 = vector.extract_strided_slice %273 {offsets = [8, 16], sizes = [8, 8], strides = [1, 1]} : vector<16x96xf32> to vector<8x8xf32>
    %281 = vector.extract_strided_slice %273 {offsets = [8, 24], sizes = [8, 8], strides = [1, 1]} : vector<16x96xf32> to vector<8x8xf32>
    %282 = vector.shape_cast %274 : vector<8x8xf32> to vector<1x8x8xf32>
    %283 = vector.shape_cast %275 : vector<8x8xf32> to vector<1x8x8xf32>
    %284 = vector.shape_cast %276 : vector<8x8xf32> to vector<1x8x8xf32>
    %285 = vector.shape_cast %277 : vector<8x8xf32> to vector<1x8x8xf32>
    %286 = vector.shape_cast %278 : vector<8x8xf32> to vector<1x8x8xf32>
    %287 = vector.shape_cast %279 : vector<8x8xf32> to vector<1x8x8xf32>
    %288 = vector.shape_cast %280 : vector<8x8xf32> to vector<1x8x8xf32>
    %289 = vector.shape_cast %281 : vector<8x8xf32> to vector<1x8x8xf32>
    %290 = tpu.concatenate %282, %283, %284, %285, %286, %287, %288, %289 in 0 : vector<1x8x8xf32>, vector<1x8x8xf32>, vector<1x8x8xf32>, vector<1x8x8xf32>, vector<1x8x8xf32>, vector<1x8x8xf32>, vector<1x8x8xf32>, vector<1x8x8xf32> -> vector<8x8x8xf32>
    %291 = vector.extract_strided_slice %273 {offsets = [0, 32], sizes = [8, 8], strides = [1, 1]} : vector<16x96xf32> to vector<8x8xf32>
    %292 = vector.extract_strided_slice %273 {offsets = [0, 40], sizes = [8, 8], strides = [1, 1]} : vector<16x96xf32> to vector<8x8xf32>
    %293 = vector.extract_strided_slice %273 {offsets = [0, 48], sizes = [8, 8], strides = [1, 1]} : vector<16x96xf32> to vector<8x8xf32>
    %294 = vector.extract_strided_slice %273 {offsets = [0, 56], sizes = [8, 8], strides = [1, 1]} : vector<16x96xf32> to vector<8x8xf32>
    %295 = vector.extract_strided_slice %273 {offsets = [8, 32], sizes = [8, 8], strides = [1, 1]} : vector<16x96xf32> to vector<8x8xf32>
    %296 = vector.extract_strided_slice %273 {offsets = [8, 40], sizes = [8, 8], strides = [1, 1]} : vector<16x96xf32> to vector<8x8xf32>
    %297 = vector.extract_strided_slice %273 {offsets = [8, 48], sizes = [8, 8], strides = [1, 1]} : vector<16x96xf32> to vector<8x8xf32>
    %298 = vector.extract_strided_slice %273 {offsets = [8, 56], sizes = [8, 8], strides = [1, 1]} : vector<16x96xf32> to vector<8x8xf32>
    %299 = vector.shape_cast %291 : vector<8x8xf32> to vector<1x8x8xf32>
    %300 = vector.shape_cast %292 : vector<8x8xf32> to vector<1x8x8xf32>
    %301 = vector.shape_cast %293 : vector<8x8xf32> to vector<1x8x8xf32>
    %302 = vector.shape_cast %294 : vector<8x8xf32> to vector<1x8x8xf32>
    %303 = vector.shape_cast %295 : vector<8x8xf32> to vector<1x8x8xf32>
    %304 = vector.shape_cast %296 : vector<8x8xf32> to vector<1x8x8xf32>
    %305 = vector.shape_cast %297 : vector<8x8xf32> to vector<1x8x8xf32>
    %306 = vector.shape_cast %298 : vector<8x8xf32> to vector<1x8x8xf32>
    %307 = tpu.concatenate %299, %300, %301, %302, %303, %304, %305, %306 in 0 : vector<1x8x8xf32>, vector<1x8x8xf32>, vector<1x8x8xf32>, vector<1x8x8xf32>, vector<1x8x8xf32>, vector<1x8x8xf32>, vector<1x8x8xf32>, vector<1x8x8xf32> -> vector<8x8x8xf32>
    %308 = vector.extract_strided_slice %273 {offsets = [0, 64], sizes = [8, 8], strides = [1, 1]} : vector<16x96xf32> to vector<8x8xf32>
    %309 = vector.extract_strided_slice %273 {offsets = [0, 72], sizes = [8, 8], strides = [1, 1]} : vector<16x96xf32> to vector<8x8xf32>
    %310 = vector.extract_strided_slice %273 {offsets = [0, 80], sizes = [8, 8], strides = [1, 1]} : vector<16x96xf32> to vector<8x8xf32>
    %311 = vector.extract_strided_slice %273 {offsets = [0, 88], sizes = [8, 8], strides = [1, 1]} : vector<16x96xf32> to vector<8x8xf32>
    %312 = vector.extract_strided_slice %273 {offsets = [8, 64], sizes = [8, 8], strides = [1, 1]} : vector<16x96xf32> to vector<8x8xf32>
    %313 = vector.extract_strided_slice %273 {offsets = [8, 72], sizes = [8, 8], strides = [1, 1]} : vector<16x96xf32> to vector<8x8xf32>
    %314 = vector.extract_strided_slice %273 {offsets = [8, 80], sizes = [8, 8], strides = [1, 1]} : vector<16x96xf32> to vector<8x8xf32>
    %315 = vector.extract_strided_slice %273 {offsets = [8, 88], sizes = [8, 8], strides = [1, 1]} : vector<16x96xf32> to vector<8x8xf32>
    %316 = vector.shape_cast %308 : vector<8x8xf32> to vector<1x8x8xf32>
    %317 = vector.shape_cast %309 : vector<8x8xf32> to vector<1x8x8xf32>
    %318 = vector.shape_cast %310 : vector<8x8xf32> to vector<1x8x8xf32>
    %319 = vector.shape_cast %311 : vector<8x8xf32> to vector<1x8x8xf32>
    %320 = vector.shape_cast %312 : vector<8x8xf32> to vector<1x8x8xf32>
    %321 = vector.shape_cast %313 : vector<8x8xf32> to vector<1x8x8xf32>
    %322 = vector.shape_cast %314 : vector<8x8xf32> to vector<1x8x8xf32>
    %323 = vector.shape_cast %315 : vector<8x8xf32> to vector<1x8x8xf32>
    %324 = tpu.concatenate %316, %317, %318, %319, %320, %321, %322, %323 in 0 : vector<1x8x8xf32>, vector<1x8x8xf32>, vector<1x8x8xf32>, vector<1x8x8xf32>, vector<1x8x8xf32>, vector<1x8x8xf32>, vector<1x8x8xf32>, vector<1x8x8xf32> -> vector<8x8x8xf32>
    "tpu.trace_start"() <{level = 10 : i32, message = "zqf,zkf->zqk"}> : () -> ()
    %cst_136 = arith.constant dense<0.000000e+00> : vector<8x8x8xf32>
    %325 = tpu.matmul %290, %307, %cst_136 {dimension_numbers = #tpu.dot_dimension_numbers<[2], [2], [1], [1], [0, 0, 0, 1, 1, 1], [0], [0]>} : vector<8x8x8xf32>, vector<8x8x8xf32>, vector<8x8x8xf32> -> vector<8x8x8xf32>
    "tpu.trace_stop"() : () -> ()
    %cst_137 = arith.constant 0.353553385 : f32
    %326 = vector.broadcast %cst_137 : f32 to vector<8x8x8xf32>
    %327 = arith.mulf %325, %326 : vector<8x8x8xf32>
    %cst_138 = arith.constant dense<0xFF800000> : vector<8x8xf32>
    %328 = vector.multi_reduction <maximumf>, %327, %cst_138 [2] : vector<8x8x8xf32> to vector<8x8xf32>
    %329 = vector.shape_cast %328 : vector<8x8xf32> to vector<8x8x1xf32>
    %330 = vector.broadcast %329 : vector<8x8x1xf32> to vector<8x8x8xf32>
    %331 = arith.subf %327, %330 : vector<8x8x8xf32>
    %332 = math.exp %331 : vector<8x8x8xf32>
    %cst_139 = arith.constant dense<0.000000e+00> : vector<8x8xf32>
    %333 = vector.multi_reduction <add>, %332, %cst_139 [2] : vector<8x8x8xf32> to vector<8x8xf32>
    %334 = vector.shape_cast %333 : vector<8x8xf32> to vector<8x8x1xf32>
    %335 = tpu.reciprocal %334 {approx = true} : vector<8x8x1xf32> -> vector<8x8x1xf32>
    %336 = vector.broadcast %335 : vector<8x8x1xf32> to vector<8x8x8xf32>
    %337 = arith.mulf %332, %336 : vector<8x8x8xf32>
    "tpu.trace_start"() <{level = 10 : i32, message = "zqk,zkf->zqf"}> : () -> ()
    %cst_140 = arith.constant dense<0.000000e+00> : vector<8x8x8xf32>
    %338 = tpu.matmul %337, %324, %cst_140 {dimension_numbers = #tpu.dot_dimension_numbers<[2], [1], [1], [2], [0, 0, 0, 1, 1, 2], [0], [0]>} : vector<8x8x8xf32>, vector<8x8x8xf32>, vector<8x8x8xf32> -> vector<8x8x8xf32>
    "tpu.trace_stop"() : () -> ()
    %339 = vector.extract_strided_slice %338 {offsets = [0, 0, 0], sizes = [1, 8, 8], strides = [1, 1, 1]} : vector<8x8x8xf32> to vector<1x8x8xf32>
    %340 = vector.shape_cast %339 : vector<1x8x8xf32> to vector<8x8xf32>
    %341 = vector.extract_strided_slice %338 {offsets = [1, 0, 0], sizes = [1, 8, 8], strides = [1, 1, 1]} : vector<8x8x8xf32> to vector<1x8x8xf32>
    %342 = vector.shape_cast %341 : vector<1x8x8xf32> to vector<8x8xf32>
    %343 = vector.extract_strided_slice %338 {offsets = [2, 0, 0], sizes = [1, 8, 8], strides = [1, 1, 1]} : vector<8x8x8xf32> to vector<1x8x8xf32>
    %344 = vector.shape_cast %343 : vector<1x8x8xf32> to vector<8x8xf32>
    %345 = vector.extract_strided_slice %338 {offsets = [3, 0, 0], sizes = [1, 8, 8], strides = [1, 1, 1]} : vector<8x8x8xf32> to vector<1x8x8xf32>
    %346 = vector.shape_cast %345 : vector<1x8x8xf32> to vector<8x8xf32>
    %347 = tpu.concatenate %340, %342, %344, %346 in 1 : vector<8x8xf32>, vector<8x8xf32>, vector<8x8xf32>, vector<8x8xf32> -> vector<8x32xf32>
    %348 = vector.extract_strided_slice %338 {offsets = [4, 0, 0], sizes = [1, 8, 8], strides = [1, 1, 1]} : vector<8x8x8xf32> to vector<1x8x8xf32>
    %349 = vector.shape_cast %348 : vector<1x8x8xf32> to vector<8x8xf32>
    %350 = vector.extract_strided_slice %338 {offsets = [5, 0, 0], sizes = [1, 8, 8], strides = [1, 1, 1]} : vector<8x8x8xf32> to vector<1x8x8xf32>
    %351 = vector.shape_cast %350 : vector<1x8x8xf32> to vector<8x8xf32>
    %352 = vector.extract_strided_slice %338 {offsets = [6, 0, 0], sizes = [1, 8, 8], strides = [1, 1, 1]} : vector<8x8x8xf32> to vector<1x8x8xf32>
    %353 = vector.shape_cast %352 : vector<1x8x8xf32> to vector<8x8xf32>
    %354 = vector.extract_strided_slice %338 {offsets = [7, 0, 0], sizes = [1, 8, 8], strides = [1, 1, 1]} : vector<8x8x8xf32> to vector<1x8x8xf32>
    %355 = vector.shape_cast %354 : vector<1x8x8xf32> to vector<8x8xf32>
    %356 = tpu.concatenate %349, %351, %353, %355 in 1 : vector<8x8xf32>, vector<8x8xf32>, vector<8x8xf32>, vector<8x8xf32> -> vector<8x32xf32>
    %357 = tpu.concatenate %347, %356 in 0 : vector<8x32xf32>, vector<8x32xf32> -> vector<16x32xf32>
    %358 = arith.truncf %357 : vector<16x32xf32> to vector<16x32xbf16>
    %cst_141 = arith.constant dense<0.000000e+00> : vector<16x32xf32>
    %359 = tpu.matmul %358, %257, %cst_141 {dimension_numbers = #tpu.dot_dimension_numbers<[1], [0], [0], [1], [0, 0, 1, 1], [], []>} : vector<16x32xbf16>, vector<32x32xbf16>, vector<16x32xf32> -> vector<16x32xf32>
    %360 = vector.broadcast %264 : vector<1x32xf32> to vector<16x32xf32>
    %361 = arith.addf %359, %360 : vector<16x32xf32>
    %362 = arith.addf %250, %361 : vector<16x32xf32>
    %cst_142 = arith.constant dense<0.000000e+00> : vector<16xf32>
    %363 = vector.multi_reduction <add>, %362, %cst_142 [1] : vector<16x32xf32> to vector<16xf32>
    %364 = vector.shape_cast %363 : vector<16xf32> to vector<16x1xf32>
    %cst_143 = arith.constant 3.200000e+01 : f32
    %365 = vector.broadcast %cst_143 : f32 to vector<16x1xf32>
    %366 = arith.divf %364, %365 : vector<16x1xf32>
    %367 = vector.broadcast %366 : vector<16x1xf32> to vector<16x32xf32>
    %368 = arith.subf %362, %367 : vector<16x32xf32>
    %369 = arith.mulf %368, %368 : vector<16x32xf32>
    %cst_144 = arith.constant dense<0.000000e+00> : vector<16xf32>
    %370 = vector.multi_reduction <add>, %369, %cst_144 [1] : vector<16x32xf32> to vector<16xf32>
    %371 = vector.shape_cast %370 : vector<16xf32> to vector<16x1xf32>
    %cst_145 = arith.constant 3.200000e+01 : f32
    %372 = vector.broadcast %cst_145 : f32 to vector<16x1xf32>
    %373 = arith.divf %371, %372 : vector<16x1xf32>
    %374 = vector.broadcast %366 : vector<16x1xf32> to vector<16x32xf32>
    %375 = arith.subf %362, %374 : vector<16x32xf32>
    %cst_146 = arith.constant 9.99999974E-6 : f32
    %376 = vector.broadcast %cst_146 : f32 to vector<16x1xf32>
    %377 = arith.addf %373, %376 : vector<16x1xf32>
    %378 = math.rsqrt %377 : vector<16x1xf32>
    %379 = vector.broadcast %378 : vector<16x1xf32> to vector<16x32xf32>
    %380 = arith.mulf %375, %379 : vector<16x32xf32>
    %381 = vector.broadcast %265 : vector<1x32xf32> to vector<16x32xf32>
    %382 = arith.mulf %380, %381 : vector<16x32xf32>
    %383 = vector.broadcast %266 : vector<1x32xf32> to vector<16x32xf32>
    %384 = arith.addf %382, %383 : vector<16x32xf32>
    %385 = arith.truncf %384 : vector<16x32xf32> to vector<16x32xbf16>
    %cst_147 = arith.constant dense<0.000000e+00> : vector<16x64xf32>
    %386 = tpu.matmul %385, %260, %cst_147 {dimension_numbers = #tpu.dot_dimension_numbers<[1], [0], [0], [1], [0, 0, 1, 1], [], []>} : vector<16x32xbf16>, vector<32x64xbf16>, vector<16x64xf32> -> vector<16x64xf32>
    %387 = vector.broadcast %262 : vector<1x64xf32> to vector<16x64xf32>
    %388 = arith.addf %386, %387 : vector<16x64xf32>
    %cst_148 = arith.constant 0.000000e+00 : f32
    %389 = vector.broadcast %cst_148 : f32 to vector<16x64xf32>
    %390 = arith.maximumf %388, %389 : vector<16x64xf32>
    %391 = arith.truncf %390 : vector<16x64xf32> to vector<16x64xbf16>
    %cst_149 = arith.constant dense<0.000000e+00> : vector<16x32xf32>
    %392 = tpu.matmul %391, %258, %cst_149 {dimension_numbers = #tpu.dot_dimension_numbers<[1], [0], [0], [1], [0, 0, 1, 1], [], []>} : vector<16x64xbf16>, vector<64x32xbf16>, vector<16x32xf32> -> vector<16x32xf32>
    %393 = vector.broadcast %267 : vector<1x32xf32> to vector<16x32xf32>
    %394 = arith.addf %392, %393 : vector<16x32xf32>
    %395 = arith.addf %384, %394 : vector<16x32xf32>
    %cst_150 = arith.constant dense<0.000000e+00> : vector<16xf32>
    %396 = vector.multi_reduction <add>, %395, %cst_150 [1] : vector<16x32xf32> to vector<16xf32>
    %397 = vector.shape_cast %396 : vector<16xf32> to vector<16x1xf32>
    %cst_151 = arith.constant 3.200000e+01 : f32
    %398 = vector.broadcast %cst_151 : f32 to vector<16x1xf32>
    %399 = arith.divf %397, %398 : vector<16x1xf32>
    %400 = vector.broadcast %399 : vector<16x1xf32> to vector<16x32xf32>
    %401 = arith.subf %395, %400 : vector<16x32xf32>
    %402 = arith.mulf %401, %401 : vector<16x32xf32>
    %cst_152 = arith.constant dense<0.000000e+00> : vector<16xf32>
    %403 = vector.multi_reduction <add>, %402, %cst_152 [1] : vector<16x32xf32> to vector<16xf32>
    %404 = vector.shape_cast %403 : vector<16xf32> to vector<16x1xf32>
    %cst_153 = arith.constant 3.200000e+01 : f32
    %405 = vector.broadcast %cst_153 : f32 to vector<16x1xf32>
    %406 = arith.divf %404, %405 : vector<16x1xf32>
    %407 = vector.broadcast %399 : vector<16x1xf32> to vector<16x32xf32>
    %408 = arith.subf %395, %407 : vector<16x32xf32>
    %cst_154 = arith.constant 9.99999974E-6 : f32
    %409 = vector.broadcast %cst_154 : f32 to vector<16x1xf32>
    %410 = arith.addf %406, %409 : vector<16x1xf32>
    %411 = math.rsqrt %410 : vector<16x1xf32>
    %412 = vector.broadcast %411 : vector<16x1xf32> to vector<16x32xf32>
    %413 = arith.mulf %408, %412 : vector<16x32xf32>
    %414 = vector.broadcast %268 : vector<1x32xf32> to vector<16x32xf32>
    %415 = arith.mulf %413, %414 : vector<16x32xf32>
    %416 = vector.broadcast %269 : vector<1x32xf32> to vector<16x32xf32>
    %417 = arith.addf %415, %416 : vector<16x32xf32>
    %418 = vector.extract_strided_slice %417 {offsets = [7, 0], sizes = [1, 32], strides = [1, 1]} : vector<16x32xf32> to vector<1x32xf32>
    %419 = vector.extract_strided_slice %417 {offsets = [15, 0], sizes = [1, 32], strides = [1, 1]} : vector<16x32xf32> to vector<1x32xf32>
    %420 = tpu.concatenate %418, %419 in 0 : vector<1x32xf32>, vector<1x32xf32> -> vector<2x32xf32>
    %421 = arith.truncf %420 : vector<2x32xf32> to vector<2x32xbf16>
    %c0_155 = arith.constant 0 : index
    %c0_156 = arith.constant 0 : index
    %422 = vector.load %arg8[%c0_155, %c0_156] : memref<32x16xbf16, #tpu.memory_space<vmem>>, vector<32x16xbf16>
    %cst_157 = arith.constant dense<0.000000e+00> : vector<2x16xf32>
    %423 = tpu.matmul %421, %422, %cst_157 {dimension_numbers = #tpu.dot_dimension_numbers<[1], [0], [0], [1], [0, 0, 1, 1], [], []>} : vector<2x32xbf16>, vector<32x16xbf16>, vector<2x16xf32> -> vector<2x16xf32>
    %c0_158 = arith.constant 0 : index
    %c0_159 = arith.constant 0 : index
    %424 = vector.load %arg9[%c0_158, %c0_159] : memref<1x16xf32, #tpu.memory_space<vmem>>, vector<1x16xf32>
    %425 = vector.broadcast %424 : vector<1x16xf32> to vector<2x16xf32>
    %426 = arith.addf %423, %425 : vector<2x16xf32>
    %c0_160 = arith.constant 0 : index
    %c0_161 = arith.constant 0 : index
    %427 = vector.load %arg10[%c0_160, %c0_161] : memref<2x16xf32, #tpu.memory_space<vmem>>, vector<2x16xf32>
    tpu.vector_store %arg10[%c0_160, %c0_161], %426 {strides = array<i32>} : memref<2x16xf32, #tpu.memory_space<vmem>>, vector<2x16xf32>,
    return
  }
  func.func @transform_0(%arg0: i32, %arg1: memref<2x8xi32, #tpu.memory_space<smem>>) -> (i32, i32, i32) {
    %c0_i32 = arith.constant 0 : i32
    %c0_i32_0 = arith.constant 0 : i32
    %c0_i32_1 = arith.constant 0 : i32
    %c0_i32_2 = arith.constant 0 : i32
    return %c0_i32, %c0_i32_0, %c0_i32_1 : i32, i32, i32
  }
  func.func @transform_1(%arg0: i32, %arg1: memref<2x8xi32, #tpu.memory_space<smem>>) -> (i32, i32, i32) {
    %c0_i32 = arith.constant 0 : i32
    %c0_i32_0 = arith.constant 0 : i32
    %c0_i32_1 = arith.constant 0 : i32
    %c0_i32_2 = arith.constant 0 : i32
    return %c0_i32, %c0_i32_0, %c0_i32_1 : i32, i32, i32
  }
  func.func @transform_2(%arg0: i32, %arg1: memref<2x8xi32, #tpu.memory_space<smem>>) -> (i32, i32, i32) {
    %c0_i32 = arith.constant 0 : i32
    %c0_i32_0 = arith.constant 0 : i32
    %c0_i32_1 = arith.constant 0 : i32
    %c0_i32_2 = arith.constant 0 : i32
    return %c0_i32, %c0_i32_0, %c0_i32_1 : i32, i32, i32
  }
  func.func @transform_3(%arg0: i32, %arg1: memref<2x8xi32, #tpu.memory_space<smem>>) -> (i32, i32, i32) {
    %c0_i32 = arith.constant 0 : i32
    %c0_i32_0 = arith.constant 0 : i32
    %c0_i32_1 = arith.constant 0 : i32
    %c0_i32_2 = arith.constant 0 : i32
    return %c0_i32, %c0_i32_0, %c0_i32_1 : i32, i32, i32
  }
  func.func @transform_4(%arg0: i32, %arg1: memref<2x8xi32, #tpu.memory_space<smem>>) -> (i32, i32, i32) {
    %c0_i32 = arith.constant 0 : i32
    %c0_i32_0 = arith.constant 0 : i32
    %c0_i32_1 = arith.constant 0 : i32
    %c0_i32_2 = arith.constant 0 : i32
    return %c0_i32, %c0_i32_0, %c0_i32_1 : i32, i32, i32
  }
  func.func @transform_5(%arg0: i32, %arg1: memref<2x8xi32, #tpu.memory_space<smem>>) -> (i32, i32) {
    %c0_i32 = arith.constant 0 : i32
    %c0_i32_0 = arith.constant 0 : i32
    %c0_i32_1 = arith.constant 0 : i32
    return %c0_i32, %c0_i32_0 : i32, i32
  }
  func.func @transform_6(%arg0: i32, %arg1: memref<2x8xi32, #tpu.memory_space<smem>>) -> (i32, i32) {
    %c0_i32 = arith.constant 0 : i32
    %c0_i32_0 = arith.constant 0 : i32
    %c0_i32_1 = arith.constant 0 : i32
    return %c0_i32, %c0_i32_0 : i32, i32
  }
  func.func @transform_7(%arg0: i32, %arg1: memref<2x8xi32, #tpu.memory_space<smem>>) -> (i32, i32) {
    %c0_i32 = arith.constant 0 : i32
    %c0_i32_0 = arith.constant 0 : i32
    %c0_i32_1 = arith.constant 0 : i32
    return %c0_i32, %c0_i32_0 : i32, i32
  }
  func.func @transform_8(%arg0: i32, %arg1: memref<2x8xi32, #tpu.memory_space<smem>>) -> (i32, i32) {
    %c0_i32 = arith.constant 0 : i32
    %c0_i32_0 = arith.constant 0 : i32
    %c0_i32_1 = arith.constant 0 : i32
    return %c0_i32, %c0_i32_0 : i32, i32
  }
}

</mosaic_0001>

<bundles_post_ra>
// kernel: charformer_forward.1
= control target key start
LH: loop header
LB: loop body
LE: loop exit
PB: predicated region body
PF: predicated region fallthrough
CT: control target
= control target key end

     0   :  { %s5076_s0 = inlined_call_operand.vmem [shape: s32[2,8], index: 0, kind: input, shape index: {}]   ;;  %s5077_s1 = inlined_call_operand.vmem [shape: bf16[2,32,96], index: 1, kind: input, shape index: {}]   ;;  %s5078_s2 = inlined_call_operand.vmem [shape: f32[2,1,96], index: 2, kind: input, shape index: {}]   ;;  %s5079_s3 = inlined_call_operand.vmem [shape: bf16[2,96,32], index: 3, kind: input, shape index: {}]   ;;  %s5080_s4 = inlined_call_operand.vmem [shape: bf16[2,32,64], index: 4, kind: input, shape index: {}]   ;;  %s5081_s5 = inlined_call_operand.vmem [shape: f32[2,1,64], index: 5, kind: input, shape index: {}]   ;;  %s5082_s6 = inlined_call_operand.vmem [shape: f32[40,32], index: 6, kind: input, shape index: {}]   ;;  %s5083_s7 = inlined_call_operand.vmem [shape: bf16[32,16], index: 7, kind: input, shape index: {}]   ;;  %s5084_s8 = inlined_call_operand.vmem [shape: f32[1,16], index: 8, kind: input, shape index: {}]   ;;  %s5085_s9 = inlined_call_operand.hbm [shape: f32[2,16], index: 9, kind: output, shape index: {}]  }
   0x1   :  { %5087 = sst [smem:[#allocation9_spill]] %s5084_s8  ;;  %s14_s11 = sshll.u32 %s5076_s0, 4  ;;  %s15_s11 = int_to_ptr.vmem [resolvable:$true] %s14_s11 }
   0x2   :  { %5088 = sst [smem:[#allocation10_spill]] %s5085_s9  ;;  %s4316_s12 = scalar_lea.vmem %s15_s11, 32 }
   0x3   :  { %p4317_p0 = scmp.ne.s32.totalorder %s15_s11, %s4316_s12  ;;  %p4321_p1 = scmp.lt.s32.totalorder %s15_s11, %s15_s11 }
   0x4   :  { %p4322_p2 = scmp.lt.s32.totalorder %s4316_s12, %s4316_s12 }
   0x6   :  { %p4323_p3 = por %p4322_p2, %p4321_p1 }
   0x8   :  { %p4324_p4 = pnand %p4323_p3, %p4317_p0 }
   0xa   :  { %4327 = shalt.err (!%p4324_p4)  }
   0xb   :  { %s4354_s13 = smov [#allocation4]  }
   0xc   :  { %17 = dma.vmem_to_smem %s15_s11, 32, %s4354_s13, [#allocation3] }
   0xd   :  { %4350 = dma.done.wait [#allocation3], 32 }
   0xe   :  { %4351 = vsyncadd [#allocation3], 4294967264 }
   0xf   :  { %19 = sfence }
  0x10   :  { %v4214_v0 = vld [vmem:[%s5077_s1] sm:$0xff]   ;;  %v4355_v1 = vmov 0.0   ;;  %v4215_v2 = vld [vmem:[%s5077_s1 + $0x8] sm:$0xff]   ;;  %vm4356_vm0 = vmmov 0   ;;  %s38_s17 = sld [smem:[#allocation4]]  ;;  %s3701_s18 = sld [smem:[#allocation4 + $0x1]] }
  0x11   :  { %3932 = vmatprep.subr.bf16.mxu0 %v4355_v1  ;;  %3940 = vmatprep.subr.mxu1 %v4355_v1  ;;  %s3703_s19 = sld [smem:[#allocation4 + $0x2]]  ;;  %s3705_s20 = sld [smem:[#allocation4 + $0x3]]  ;;  %vm42_vm1 = vcmask 253952   ;;  %v119_v19 = vld [vmem:[%s5082_s6 + $0x20] sm:$0xff] }
  0x12   :  { %3933 = vmatpush3.bf16.msra.mxu0 %v4214_v0  ;;  %3936 = vmatprep.mubr.msk.bf16.mxu0 %vm4356_vm0, %v4355_v1  ;;  %s3707_s21 = sld [smem:[#allocation4 + $0x4]]  ;;  %s3709_s22 = sld [smem:[#allocation4 + $0x5]] }
  0x13   :  { %3934 = vmatprep.subr.bf16.mxu0 %v4355_v1  ;;  %3942 = vmatprep.mubr.msk.f32.mxu1 %vm4356_vm0, %v4355_v1  ;;  %s3711_s23 = sld [smem:[#allocation4 + $0x6]]  ;;  %s3713_s24 = sld [smem:[#allocation4 + $0x7]] }
  0x14   :  { %s4432_s25 = sld [smem:[#allocation4 + $0x80]]  ;;  %s4434_s26 = sld [smem:[#allocation4 + $0x81]] }
  0x15   :  { %s4436_s27 = sld [smem:[#allocation4 + $0x82]]  ;;  %s4438_s28 = sld [smem:[#allocation4 + $0x83]] }
  0x16   :  { %3935 = vmatpush3.bf16.msra.mxu0 %v4215_v2  ;;  %s3668_s10 = scalar_lea.vmem %s5082_s6, %s38_s17  ;;  %s3670_s13 = scalar_lea.vmem %s5082_s6, %s3701_s18 }
  0x17   :  { %3955 = vmatprep.subr.mxu0 %v4355_v1  ;;  %v3700_v3 = vld [vmem:[%s3668_s10 + $0x10] sm:$0x1]  ;;  %s3672_s0 = scalar_lea.vmem %s5082_s6, %s3703_s19  ;;  %s3674_s8 = scalar_lea.vmem %s5082_s6, %s3705_s20 }
  0x18   :  { %v3702_v4 = vld [vmem:[%s3670_s13 + $0x10] sm:$0x1]  ;;  %43 = vst.msk [vmem:[#allocation2] sm:$0x1] %vm42_vm1, %v3700_v3  ;;  %s3676_s29 = scalar_lea.vmem %s5082_s6, %s3707_s21  ;;  %s3678_s19 = scalar_lea.vmem %s5082_s6, %s3709_s22 }
  0x19   :  { %48 = vst.msk [vmem:[#allocation2 + $0x1] sm:$0x1] %vm42_vm1, %v3702_v4  ;;  %v3704_v5 = vld [vmem:[%s3672_s0 + $0x10] sm:$0x1]  ;;  %s3682_s21 = scalar_lea.vmem %s5082_s6, %s3713_s24  ;;  %s3727_s10 = sld [smem:[#allocation4 + $0x86]] }
  0x1a   :  { %v3706_v6 = vld [vmem:[%s3674_s8 + $0x10] sm:$0x1]  ;;  %53 = vst.msk [vmem:[#allocation2 + $0x2] sm:$0x1] %vm42_vm1, %v3704_v5  ;;  %s3680_s8 = scalar_lea.vmem %s5082_s6, %s3711_s23  ;;  %s3684_s14 = scalar_lea.vmem %s5082_s6, %s4432_s25 }
  0x1b   :  { %58 = vst.msk [vmem:[#allocation2 + $0x3] sm:$0x1] %vm42_vm1, %v3706_v6  ;;  %v3708_v7 = vld [vmem:[%s3676_s29 + $0x10] sm:$0x1]  ;;  %s3686_s16 = scalar_lea.vmem %s5082_s6, %s4434_s26  ;;  %s3688_s17 = scalar_lea.vmem %s5082_s6, %s4436_s27 }
  0x1c   :  { %v3710_v8 = vld [vmem:[%s3678_s19 + $0x10] sm:$0x1]  ;;  %63 = vst.msk [vmem:[#allocation2 + $0x4] sm:$0x1] %vm42_vm1, %v3708_v7  ;;  %s3690_s30 = scalar_lea.vmem %s5082_s6, %s4438_s28  ;;  %s3723_s25 = sld [smem:[#allocation4 + $0x84]] }
  0x1d   :  { %68 = vst.msk [vmem:[#allocation2 + $0x5] sm:$0x1] %vm42_vm1, %v3710_v8  ;;  %v3712_v9 = vld [vmem:[%s3680_s8 + $0x10] sm:$0x1]  ;;  %s3725_s26 = sld [smem:[#allocation4 + $0x85]]  ;;  %s3729_s19 = sld [smem:[#allocation4 + $0x87]] }
  0x1e   :  { %v3714_v10 = vld [vmem:[%s3682_s21 + $0x10] sm:$0x1]  ;;  %73 = vst.msk [vmem:[#allocation2 + $0x6] sm:$0x1] %vm42_vm1, %v3712_v9 }
  0x1f   :  { %78 = vst.msk [vmem:[#allocation2 + $0x7] sm:$0x1] %vm42_vm1, %v3714_v10  ;;  %v3716_v11 = vld [vmem:[%s3684_s14 + $0x10] sm:$0x1]  ;;  %s3696_s22 = scalar_lea.vmem %s5082_s6, %s3727_s10 }
  0x20   :  { %v3718_v12 = vld [vmem:[%s3686_s16 + $0x10] sm:$0x1]  ;;  %83 = vst.msk [vmem:[#allocation2 + $0x8] sm:$0x1] %vm42_vm1, %v3716_v11 }
  0x21   :  { %88 = vst.msk [vmem:[#allocation2 + $0x9] sm:$0x1] %vm42_vm1, %v3718_v12  ;;  %v3720_v13 = vld [vmem:[%s3688_s17 + $0x10] sm:$0x1] }
  0x22   :  { %v3722_v14 = vld [vmem:[%s3690_s30 + $0x10] sm:$0x1]  ;;  %93 = vst.msk [vmem:[#allocation2 + $0xa] sm:$0x1] %vm42_vm1, %v3720_v13  ;;  %s3692_s20 = scalar_lea.vmem %s5082_s6, %s3723_s25 }
  0x23   :  { %98 = vst.msk [vmem:[#allocation2 + $0xb] sm:$0x1] %vm42_vm1, %v3722_v14  ;;  %v3724_v15 = vld [vmem:[%s3692_s20 + $0x10] sm:$0x1]  ;;  %s3694_s11 = scalar_lea.vmem %s5082_s6, %s3725_s26  ;;  %s3698_s15 = scalar_lea.vmem %s5082_s6, %s3729_s19 }
  0x24   :  { %103 = vst.msk [vmem:[#allocation2 + $0xc] sm:$0x1] %vm42_vm1, %v3724_v15  ;;  %v3726_v16 = vld [vmem:[%s3694_s11 + $0x10] sm:$0x1] }
  0x25   :  { %v3728_v17 = vld [vmem:[%s3696_s22 + $0x10] sm:$0x1]  ;;  %108 = vst.msk [vmem:[#allocation2 + $0xd] sm:$0x1] %vm42_vm1, %v3726_v16 }
  0x26   :  { %113 = vst.msk [vmem:[#allocation2 + $0xe] sm:$0x1] %vm42_vm1, %v3728_v17  ;;  %v3730_v18 = vld [vmem:[%s3698_s15 + $0x10] sm:$0x1]  ;;  %v120_v20 = vld [vmem:[#allocation2] sm:$0xff] }
  0x27   :  { %118 = vst.msk [vmem:[#allocation2 + $0xf] sm:$0x1] %vm42_vm1, %v3730_v18 }
  0x28   :  { %20 = vsyncpa [#allocation6], 0  ;;  %v4512_v21 = vadd.f32 %v120_v20, %v119_v19  ;;  %vm166_vm2 = vcmask 261120   ;;  %v3731_v25 = vld [vmem:[%s5078_s2] ss:$0 sm:$0xff]  ;;  %s4357_s17 = smov 104  }
  0x29   :  { %s4358_s18 = smov 120   ;;  %s4359_s29 = smov 112   ;;  %vm227_vm3 = vcmask 64512   ;;  %vm1551_vm4 = vcmask 130048   ;;  %vm1553_vm5 = vcmask 195584   ;;  %vm1766_vm6 = vcmask 523264  }
  0x2a   :  { %s4360_s30 = smov 96   ;;  %s4361_s25 = smov 64   ;;  %vm3583_vm7 = vcmask 1040384   ;;  %vm3652_vm8 = vcmask 123904  }
  0x2b   :  { %s4362_s27 = smov 16   ;;  %s4363_s20 = smov 8  }
  0x2c   :  { %s4364_s28 = smov 24   ;;  %s5089_s11 = sld [smem:[#allocation9_spill]] }
  0x2d   :  { %s4365_s12 = smov [#allocation5]  }
  0x2e   :  { %v121_v22 = vld [vmem:[#allocation2 + $0x8] sm:$0xff]  ;;  %s3660_s21 = sshll.u32 %s4365_s12, 4  ;;  %s3661_s21 = int_to_ptr.vmem [resolvable:$true] %s3660_s21 }
  0x2f   :  { %v4514_v23 = vadd.f32 %v121_v22, %v119_v19  ;;  %p4333_p6 = scmp.lt.s32.totalorder %s3661_s21, %s3661_s21 }
  0x31   :  { %v147_v24 = vpack.c.bf16 %v4514_v23, %v4512_v21 }
  0x33   :  { %3937 = vmatmul.mubr.msk.bf16.vlgmr.msra.gmra.mrb[0].mxu0 %vm166_vm2, %v147_v24 }
  0x34   :  { %3957 = vmatprep.mubr.msk.f32.mxu0 %vm4356_vm0, %v4355_v1 }
 0x106   :  { %v204_v26 = vpop.f32.mrb[0].mxu0 }
 0x107   :  { %v4524_v27 = vadd.f32 %v3731_v25, %v204_v26  ;;  %v3938_v28 = vpop.f32.mrb[1].mxu0 }
 0x108   :  { %v207_v29 = vpop.f32.mrb[2].mxu0 }
 0x109   :  { %216 = vrot.lane.b32.xlu1 %v4524_v27, %s4357_s17  ;;  %212 = vrot.lane.b32.xlu0 %v4524_v27, %s4358_s18  ;;  %v3939_v30 = vpop.f32.mrb[3].mxu0  ;;  %v4530_v31 = vadd.f32 %v3731_v25, %v207_v29 }
 0x10d   :  { %214 = vrot.lane.b32.xlu0 %v4524_v27, %s4359_s29  ;;  %219 = vrot.lane.b32.xlu1 %v4530_v31, %s4358_s18 }
 0x111   :  { %221 = vrot.lane.b32.xlu0 %v4530_v31, %s4359_s29  ;;  %223 = vrot.lane.b32.xlu1 %v4530_v31, %s4357_s17 }
 0x115   :  { %225 = vrot.lane.b32.xlu0 %v4524_v27, %s4360_s30 }
 0x17b   :  { %v4542_v32 = vpop.permute.xlu0 %212  ;;  %v4544_v33 = vpop.permute.xlu1 %216 }
 0x17c   :  { %302 = vrot.lane.b32.xlu1 %v4542_v32, %s4360_s30 }
 0x17f   :  { %v4548_v34 = vpop.permute.xlu0 %214  ;;  %v4554_v35 = vpop.permute.xlu1 %219 }
 0x180   :  { %378 = vrot.lane.b32.xlu0 %v4548_v34, %s4360_s30  ;;  %454 = vrot.lane.b32.xlu1 %v4544_v33, %s4360_s30 }
 0x183   :  { %v4556_v36 = vpop.permute.xlu0 %221  ;;  %v4562_v38 = vpop.permute.xlu1 %223 }
 0x184   :  { %530 = vrot.lane.b32.xlu0 %v4530_v31, %s4360_s30  ;;  %606 = vrot.lane.b32.xlu1 %v4554_v35, %s4360_s30 }
 0x187   :  { %v226_v37 = vpop.permute.xlu0 %225 }
 0x188   :  { %682 = vrot.lane.b32.xlu0 %v4556_v36, %s4360_s30  ;;  %3941 = vmatpush3.xpose.msk.msra.mxu1 %vm227_vm3, %v226_v37 }
 0x189   :  { %758 = vrot.lane.b32.xlu1 %v4562_v38, %s4360_s30  ;;  %3945 = vmatprep.subr.mxu1 %v4355_v1 }
 0x18b   :  { %3943 = vmatmul.mubr.msk.f32.vlgmr.msra.gmra.mrb[0].mxu1 %vm227_vm3, %v4524_v27 }
 0x18c   :  { %3947 = vmatprep.mubr.msk.f32.mxu1 %vm4356_vm0, %v4355_v1 }
 0x1ee   :  { %v303_v39 = vpop.permute.xlu1 %302 }
 0x1ef   :  { %3946 = vmatpush3.xpose.msk.msra.mxu1 %vm227_vm3, %v303_v39 }
 0x1f0   :  { %3950 = vmatprep.subr.mxu1 %v4355_v1 }
 0x1f2   :  { %v379_v40 = vpop.permute.xlu0 %378  ;;  %3948 = vmatmul.mubr.msk.f32.vlgmr.msra.gmra.mrb[2].mxu1 %vm227_vm3, %v4542_v32  ;;  %v455_v41 = vpop.permute.xlu1 %454 }
 0x1f3   :  { %3951 = vmatpush3.xpose.msk.msra.mxu1 %vm227_vm3, %v379_v40  ;;  %3956 = vmatpush3.xpose.msk.msra.mxu0 %vm227_vm3, %v455_v41 }
 0x1f4   :  { %3952 = vmatprep.mubr.msk.f32.mxu1 %vm4356_vm0, %v4355_v1  ;;  %3960 = vmatprep.subr.mxu1 %v4355_v1 }
 0x1f5   :  { %3965 = vmatprep.subr.mxu0 %v4355_v1 }
 0x1f6   :  { %v531_v42 = vpop.permute.xlu0 %530  ;;  %3953 = vmatmul.mubr.msk.f32.vlgmr.msra.gmra.mrb[4].mxu1 %vm227_vm3, %v4548_v34  ;;  %3958 = vmatmul.mubr.msk.f32.vlgmr.msra.gmra.mrb[4].mxu0 %vm227_vm3, %v4544_v33  ;;  %v607_v43 = vpop.permute.xlu1 %606 }
 0x1f7   :  { %3961 = vmatpush3.xpose.msk.msra.mxu1 %vm227_vm3, %v531_v42  ;;  %3966 = vmatpush3.xpose.msk.msra.mxu0 %vm227_vm3, %v607_v43 }
 0x1f8   :  { %3962 = vmatprep.mubr.msk.f32.mxu1 %vm4356_vm0, %v4355_v1  ;;  %3967 = vmatprep.mubr.msk.f32.mxu0 %vm4356_vm0, %v4355_v1 }
 0x1f9   :  { %3970 = vmatprep.subr.mxu1 %v4355_v1  ;;  %3975 = vmatprep.subr.mxu0 %v4355_v1 }
 0x1fa   :  { %v683_v44 = vpop.permute.xlu0 %682  ;;  %3963 = vmatmul.mubr.msk.f32.vlgmr.msra.gmra.mrb[6].mxu1 %vm227_vm3, %v4530_v31  ;;  %3968 = vmatmul.mubr.msk.f32.vlgmr.msra.gmra.mrb[6].mxu0 %vm227_vm3, %v4554_v35 }
 0x1fb   :  { %v759_v45 = vpop.permute.xlu1 %758  ;;  %3971 = vmatpush3.xpose.msk.msra.mxu1 %vm227_vm3, %v683_v44  ;;  %3972 = vmatprep.mubr.msk.f32.mxu1 %vm4356_vm0, %v4355_v1 }
 0x1fc   :  { %3976 = vmatpush3.xpose.msk.msra.mxu0 %vm227_vm3, %v759_v45  ;;  %3977 = vmatprep.mubr.msk.f32.mxu0 %vm4356_vm0, %v4355_v1 }
 0x1fd   :  { %3980 = vmatprep.subr.mxu1 %v4355_v1  ;;  %3985 = vmatprep.subr.mxu0 %v4355_v1 }
 0x1fe   :  { %3973 = vmatmul.mubr.msk.f32.vlgmr.msra.gmra.mrb[8].mxu1 %vm227_vm3, %v4556_v36 }
 0x1ff   :  { %3978 = vmatmul.mubr.msk.f32.vlgmr.msra.gmra.mrb[8].mxu0 %vm227_vm3, %v4562_v38  ;;  %3982 = vmatprep.mubr.msk.f32.mxu1 %vm4356_vm0, %v4355_v1 }
 0x200   :  { %3987 = vmatprep.mubr.msk.f32.mxu0 %vm4356_vm0, %v4355_v1 }
 0x25e   :  { %v298_v46 = vpop.f32.mrb[0].mxu1 }
 0x25f   :  { %v834_v47 = vmul.f32 0.35355338, %v298_v46  ;;  %v3944_v48 = vpop.f32.mrb[1].mxu1 }
 0x261   :  { %v842_v49 = vsel %vm227_vm3, %v834_v47, -inf }
 0x262   :  { %843 = vmax.xlane.f32.xlu0 %v842_v49 }
 0x2c5   :  { %v374_v50 = vpop.f32.mrb[2].mxu1 }
 0x2c6   :  { %v835_v51 = vmul.f32 0.35355338, %v374_v50  ;;  %v3949_v52 = vpop.f32.mrb[3].mxu1 }
 0x2c8   :  { %v845_v53 = vsel %vm227_vm3, %v835_v51, -inf }
 0x2c9   :  { %846 = vmax.xlane.f32.xlu1 %v845_v53  ;;  %v450_v54 = vpop.f32.mrb[4].mxu1  ;;  %v526_v55 = vpop.f32.mrb[4].mxu0 }
 0x2ca   :  { %v836_v56 = vmul.f32 0.35355338, %v450_v54  ;;  %v3954_v57 = vpop.f32.mrb[5].mxu1  ;;  %v3959_v58 = vpop.f32.mrb[5].mxu0  ;;  %v837_v59 = vmul.f32 0.35355338, %v526_v55 }
 0x2cc   :  { %v848_v60 = vsel %vm227_vm3, %v836_v56, -inf  ;;  %v851_v5 = vsel %vm227_vm3, %v837_v59, -inf }
 0x2cd   :  { %849 = vmax.xlane.f32.xlu0 %v848_v60  ;;  %v602_v61 = vpop.f32.mrb[6].mxu1  ;;  %v678_v62 = vpop.f32.mrb[6].mxu0 }
 0x2ce   :  { %v838_v63 = vmul.f32 0.35355338, %v602_v61  ;;  %v3964_v0 = vpop.f32.mrb[7].mxu1  ;;  %v3969_v2 = vpop.f32.mrb[7].mxu0  ;;  %v839_v3 = vmul.f32 0.35355338, %v678_v62 }
 0x2d0   :  { %v854_v4 = vsel %vm227_vm3, %v838_v63, -inf  ;;  %v857_v13 = vsel %vm227_vm3, %v839_v3, -inf }
 0x2d1   :  { %855 = vmax.xlane.f32.xlu1 %v854_v4  ;;  %v754_v6 = vpop.f32.mrb[8].mxu1  ;;  %852 = vmax.xlane.f32.xlu0 %v851_v5 }
 0x2d2   :  { %v840_v7 = vmul.f32 0.35355338, %v754_v6  ;;  %v830_v8 = vpop.f32.mrb[8].mxu0  ;;  %v3974_v9 = vpop.f32.mrb[9].mxu1 }
 0x2d3   :  { %v3979_v10 = vpop.f32.mrb[9].mxu0  ;;  %v841_v11 = vmul.f32 0.35355338, %v830_v8 }
 0x2d4   :  { %v860_v12 = vsel %vm227_vm3, %v840_v7, -inf }
 0x2d5   :  { %861 = vmax.xlane.f32.xlu1 %v860_v12  ;;  %858 = vmax.xlane.f32.xlu0 %v857_v13  ;;  %v863_v14 = vsel %vm227_vm3, %v841_v11, -inf }
 0x2d9   :  { %864 = vmax.xlane.f32.xlu0 %v863_v14 }
 0x2e6   :  { %930 = vrot.lane.b32.xlu1 %v4524_v27, %s4361_s25 }
 0x2ea   :  { %1082 = vrot.lane.b32.xlu1 %v4548_v34, %s4361_s25 }
 0x2ee   :  { %1158 = vrot.lane.b32.xlu1 %v4544_v33, %s4361_s25 }
 0x2ef   :  { %1006 = vrot.lane.b32.xlu0 %v4542_v32, %s4361_s25  ;;  %v844_v15 = vpop.xlane.xlu0 %843 }
 0x2f0   :  { %v866_v16 = vsub.f32 %v834_v47, %v844_v15 }
 0x2f2   :  { %1310 = vrot.lane.b32.xlu1 %v4554_v35, %s4361_s25  ;;  %v874_v17 = vmul.f32 1.442695, %v866_v16 }
 0x2f3   :  { %1234 = vrot.lane.b32.xlu0 %v4530_v31, %s4361_s25 }
 0x2f4   :  { %4236 = vpow2.f32 %v874_v17 }
 0x2fe   :  { %v4636_v18 = vpop.eup %4236 }
 0x2ff   :  { %v890_v19 = vsel %vm227_vm3, %v4636_v18, 0.0 }
 0x316   :  { %891 = vadd.xlane.f32.xlu1 %v890_v19 }
 0x356   :  { %v847_v20 = vpop.xlane.xlu1 %846 }
 0x357   :  { %v867_v22 = vsub.f32 %v835_v51, %v847_v20 }
 0x359   :  { %v876_v24 = vmul.f32 1.442695, %v867_v22 }
 0x35a   :  { %v850_v25 = vpop.xlane.xlu0 %849 }
 0x35b   :  { %4238 = vpow2.f32 %v876_v24  ;;  %v868_v26 = vsub.f32 %v836_v56, %v850_v25 }
 0x35d   :  { %v878_v27 = vmul.f32 1.442695, %v868_v26 }
 0x35e   :  { %v856_v28 = vpop.xlane.xlu1 %855  ;;  %v853_v29 = vpop.xlane.xlu0 %852 }
 0x35f   :  { %4240 = vpow2.f32 %v878_v27  ;;  %v870_v30 = vsub.f32 %v838_v63, %v856_v28  ;;  %v869_v31 = vsub.f32 %v837_v59, %v853_v29 }
 0x361   :  { %v882_v32 = vmul.f32 1.442695, %v870_v30  ;;  %v880_v33 = vmul.f32 1.442695, %v869_v31 }
 0x362   :  { %v862_v34 = vpop.xlane.xlu1 %861  ;;  %v859_v35 = vpop.xlane.xlu0 %858 }
 0x363   :  { %4242 = vpow2.f32 %v882_v32  ;;  %v872_v37 = vsub.f32 %v840_v7, %v862_v34  ;;  %v871_v39 = vsub.f32 %v839_v3, %v859_v35 }
 0x364   :  { %4244 = vpow2.f32 %v880_v33  ;;  %v4216_v33 = vld [vmem:[%s5079_s3] sm:$0xff]  }
 0x365   :  { %v4239_v40 = vpop.eup %4238  ;;  %v886_v41 = vmul.f32 1.442695, %v872_v37  ;;  %v884_v42 = vmul.f32 1.442695, %v871_v39  ;;  %v4217_v37 = vld [vmem:[%s5079_s3 + $0x8] sm:$0xff]  }
 0x366   :  { %v931_v43 = vpop.permute.xlu1 %930  ;;  %v865_v44 = vpop.xlane.xlu0 %864  ;;  %v893_v45 = vsel %vm227_vm3, %v4239_v40, 0.0 }
 0x367   :  { %4246 = vpow2.f32 %v886_v41  ;;  %v873_v46 = vsub.f32 %v841_v11, %v865_v44  ;;  %3981 = vmatpush3.msra.mxu1 %v931_v43  ;;  %894 = vadd.xlane.f32.xlu0 %v893_v45 }
 0x368   :  { %4248 = vpow2.f32 %v884_v42  ;;  %3990 = vmatprep.subr.mxu1 %v4355_v1 }
 0x369   :  { %v4241_v47 = vpop.eup %4240  ;;  %v888_v48 = vmul.f32 1.442695, %v873_v46 }
 0x36a   :  { %v1007_v49 = vpop.permute.xlu0 %1006  ;;  %v896_v50 = vsel %vm227_vm3, %v4241_v47, 0.0  ;;  %v1083_v61 = vpop.permute.xlu1 %1082 }
 0x36b   :  { %4250 = vpow2.f32 %v888_v48  ;;  %897 = vadd.xlane.f32.xlu1 %v896_v50  ;;  %3986 = vmatpush3.msra.mxu0 %v1007_v49 }
 0x36c   :  { %3995 = vmatprep.subr.mxu0 %v4355_v1 }
 0x36d   :  { %v4243_v51 = vpop.eup %4242 }
 0x36e   :  { %v4245_v52 = vpop.eup %4244  ;;  %v902_v53 = vsel %vm227_vm3, %v4243_v51, 0.0  ;;  %v1159_v62 = vpop.permute.xlu1 %1158 }
 0x36f   :  { %903 = vadd.xlane.f32.xlu1 %v902_v53  ;;  %v899_v54 = vsel %vm227_vm3, %v4245_v52, 0.0 }
 0x370   :  { %900 = vadd.xlane.f32.xlu0 %v899_v54 }
 0x371   :  { %v4247_v55 = vpop.eup %4246 }
 0x372   :  { %v4249_v56 = vpop.eup %4248  ;;  %v908_v57 = vsel %vm227_vm3, %v4247_v55, 0.0  ;;  %v1311_v63 = vpop.permute.xlu1 %1310 }
 0x373   :  { %909 = vadd.xlane.f32.xlu1 %v908_v57  ;;  %v905_v58 = vsel %vm227_vm3, %v4249_v56, 0.0 }
 0x374   :  { %906 = vadd.xlane.f32.xlu0 %v905_v58 }
 0x375   :  { %v4648_v59 = vpop.eup %4250 }
 0x376   :  { %v911_v60 = vsel %vm227_vm3, %v4648_v59, 0.0 }
 0x378   :  { %912 = vadd.xlane.f32.xlu0 %v911_v60 }
 0x384   :  { %1462 = vrot.lane.b32.xlu1 %v4562_v38, %s4361_s25  ;;  %v1235_v38 = vpop.permute.xlu0 %1234 }
 0x38e   :  { %1386 = vrot.lane.b32.xlu0 %v4556_v36, %s4361_s25 }
 0x3a3   :  { %v892_v0 = vpop.xlane.xlu1 %891 }
 0x3a4   :  { %4252 = vrcp.f32 %v892_v0 }
 0x3ae   :  { %v4253_v2 = vpop.eup %4252 }
 0x3af   :  { %v922_v3 = vmul.f32 %v4253_v2, %v4636_v18 }
 0x3b1   :  { %3983 = vmatmul.mubr.msk.f32.vlgmr.msra.gmra.mrb[10].mxu1 %vm227_vm3, %v922_v3 }
 0x3b2   :  { %3991 = vmatpush3.msra.mxu1 %v1083_v61  ;;  %3992 = vmatprep.mubr.msk.f32.mxu1 %vm4356_vm0, %v4355_v1 }
 0x3b3   :  { %4000 = vmatprep.subr.mxu1 %v4355_v1 }
 0x3f4   :  { %v895_v4 = vpop.xlane.xlu0 %894 }
 0x3f5   :  { %4254 = vrcp.f32 %v895_v4 }
 0x3f8   :  { %v898_v36 = vpop.xlane.xlu1 %897 }
 0x3f9   :  { %4256 = vrcp.f32 %v898_v36 }
 0x3fc   :  { %v904_v5 = vpop.xlane.xlu1 %903 }
 0x3fd   :  { %4258 = vrcp.f32 %v904_v5  ;;  %v901_v6 = vpop.xlane.xlu0 %900  ;;  %v4714_v5 = vld [vmem:[%s5082_s6] sm:$0xff] }
 0x3fe   :  { %4260 = vrcp.f32 %v901_v6 }
 0x3ff   :  { %v4255_v7 = vpop.eup %4254 }
 0x400   :  { %v923_v8 = vmul.f32 %v4255_v7, %v4239_v40  ;;  %v910_v9 = vpop.xlane.xlu1 %909 }
 0x401   :  { %4262 = vrcp.f32 %v910_v9  ;;  %v907_v10 = vpop.xlane.xlu0 %906 }
 0x402   :  { %4264 = vrcp.f32 %v907_v10  ;;  %3988 = vmatmul.mubr.msk.f32.vlgmr.msra.gmra.mrb[10].mxu0 %vm227_vm3, %v923_v8 }
 0x403   :  { %v4257_v11 = vpop.eup %4256  ;;  %3996 = vmatpush3.msra.mxu0 %v1159_v62  ;;  %3997 = vmatprep.mubr.msk.f32.mxu0 %vm4356_vm0, %v4355_v1 }
 0x404   :  { %v924_v12 = vmul.f32 %v4257_v11, %v4241_v47  ;;  %4005 = vmatprep.subr.mxu0 %v4355_v1  ;;  %v1463_v25 = vpop.permute.xlu1 %1462 }
 0x405   :  { %v913_v13 = vpop.xlane.xlu0 %912 }
 0x406   :  { %4266 = vrcp.f32 %v913_v13  ;;  %3993 = vmatmul.mubr.msk.f32.vlgmr.msra.gmra.mrb[12].mxu1 %vm227_vm3, %v924_v12 }
 0x407   :  { %v4259_v14 = vpop.eup %4258  ;;  %4001 = vmatpush3.msra.mxu1 %v1235_v38  ;;  %4002 = vmatprep.mubr.msk.f32.mxu1 %vm4356_vm0, %v4355_v1  ;;  %v1571_v38 = vlaneseq }
 0x408   :  { %v4261_v15 = vpop.eup %4260  ;;  %v926_v16 = vmul.f32 %v4259_v14, %v4243_v51  ;;  %4010 = vmatprep.subr.mxu1 %v4355_v1 }
 0x409   :  { %v925_v17 = vmul.f32 %v4261_v15, %v4245_v52  ;;  %v1387_v18 = vpop.permute.xlu0 %1386  ;;  %v4708_v4 = vshrl.u32 %v1571_v38, 7 }
 0x40a   :  { %4003 = vmatmul.mubr.msk.f32.vlgmr.msra.gmra.mrb[14].mxu1 %vm227_vm3, %v926_v16 }
 0x40b   :  { %v4263_v19 = vpop.eup %4262  ;;  %3998 = vmatmul.mubr.msk.f32.vlgmr.msra.gmra.mrb[12].mxu0 %vm227_vm3, %v925_v17  ;;  %4011 = vmatpush3.msra.mxu1 %v1387_v18  ;;  %v1573_v36 = vsub.s32 0, %v4708_v4 }
 0x40c   :  { %v4265_v20 = vpop.eup %4264  ;;  %v928_v22 = vmul.f32 %v4263_v19, %v4247_v55  ;;  %4006 = vmatpush3.msra.mxu0 %v1311_v63  ;;  %4007 = vmatprep.mubr.msk.f32.mxu0 %vm4356_vm0, %v4355_v1 }
 0x40d   :  { %v927_v24 = vmul.f32 %v4265_v20, %v4249_v56  ;;  %4012 = vmatprep.mubr.msk.f32.mxu1 %vm4356_vm0, %v4355_v1  ;;  %4015 = vmatprep.subr.mxu0 %v4355_v1  ;;  %v1574_v6 = vrot.slane %v4714_v5, %v1573_v36 }
 0x40e   :  { %4013 = vmatmul.mubr.msk.f32.vlgmr.msra.gmra.mrb[16].mxu1 %vm227_vm3, %v928_v22  ;;  %4020 = vmatprep.subr.bf16.mxu1 %v4355_v1 }
 0x40f   :  { %4008 = vmatmul.mubr.msk.f32.vlgmr.msra.gmra.mrb[14].mxu0 %vm227_vm3, %v927_v24  ;;  %4024 = vmatprep.mubr.msk.bf16.mxu1 %vm4356_vm0, %v4355_v1 }
 0x410   :  { %v4267_v26 = vpop.eup %4266  ;;  %4016 = vmatpush3.msra.mxu0 %v1463_v25  ;;  %4017 = vmatprep.mubr.msk.f32.mxu0 %vm4356_vm0, %v4355_v1 }
 0x411   :  { %v929_v27 = vmul.f32 %v4267_v26, %v4648_v59  ;;  %4028 = vmatprep.subr.bf16.mxu0 %v4355_v1  ;;  %4021 = vmatpush3.bf16.msra.mxu1 %v4216_v33 }
 0x412   :  { %4022 = vmatprep.subr.bf16.mxu1 %v4355_v1 }
 0x413   :  { %4018 = vmatmul.mubr.msk.f32.vlgmr.msra.gmra.mrb[16].mxu0 %vm227_vm3, %v929_v27 }
 0x414   :  { %4032 = vmatprep.mubr.msk.bf16.mxu0 %vm4356_vm0, %v4355_v1 }
 0x415   :  { %4023 = vmatpush3.bf16.msra.mxu1 %v4217_v37 }
 0x416   :  { %4036 = vmatprep.subr.bf16.mxu1 %v4355_v1 }
 0x484   :  { %v1002_v28 = vpop.f32.mrb[10].mxu1 }
 0x485   :  { %v3984_v29 = vpop.f32.mrb[11].mxu1 }
 0x486   :  { %v4220_v29 = vld [vmem:[%s5079_s3 + $0x10] sm:$0xff]  }
 0x4d5   :  { %v1078_v30 = vpop.f32.mrb[10].mxu0 }
 0x4d6   :  { %v3989_v31 = vpop.f32.mrb[11].mxu0 }
 0x4d9   :  { %v1154_v32 = vpop.f32.mrb[12].mxu1 }
 0x4da   :  { %v3994_v34 = vpop.f32.mrb[13].mxu1 }
 0x4dd   :  { %v1306_v35 = vpop.f32.mrb[14].mxu1 }
 0x4de   :  { %v1230_v39 = vpop.f32.mrb[12].mxu0  ;;  %v4004_v40 = vpop.f32.mrb[15].mxu1 }
 0x4df   :  { %v3999_v41 = vpop.f32.mrb[13].mxu0 }
 0x4e0   :  { %v1668_v41 = vsub.s32 2, %v4708_v4 }
 0x4e1   :  { %v1458_v42 = vpop.f32.mrb[16].mxu1 }
 0x4e2   :  { %v1382_v43 = vpop.f32.mrb[14].mxu0  ;;  %v4189_v44 = vpack.i.bf16 %v1458_v42, %v1154_v32  ;;  %v4014_v45 = vpop.f32.mrb[17].mxu1 }
 0x4e3   :  { %v4184_v46 = vpack.i.bf16 %v1382_v43, %v1078_v30  ;;  %v4009_v47 = vpop.f32.mrb[15].mxu0  ;;  %v4221_v30 = vld [vmem:[%s5079_s3 + $0x18] sm:$0xff]  }
 0x4e4   :  { %4190 = vrot.lane.b32.xlu1 %v4189_v44, %s4362_s27  ;;  %v1669_v47 = vrot.slane %v4714_v5, %v1668_v41 }
 0x4e5   :  { %4185 = vrot.lane.b32.xlu0 %v4184_v46, %s4363_s20 }
 0x4e6   :  { %v1534_v48 = vpop.f32.mrb[16].mxu0 }
 0x4e7   :  { %v4194_v49 = vpack.i.bf16 %v1534_v48, %v1230_v39  ;;  %v4019_v50 = vpop.f32.mrb[17].mxu0  ;;  %v1662_v39 = vsub.s32 1, %v4708_v4 }
 0x4e9   :  { %4195 = vrot.lane.b32.xlu0 %v4194_v49, %s4364_s28  ;;  %v1663_v40 = vrot.slane %v4714_v5, %v1662_v39 }
 0x556   :  { %v4191_v51 = vpop.permute.xlu1 %4190 }
 0x557   :  { %v4186_v52 = vpop.permute.xlu0 %4185  ;;  %v4193_v55 = vunpack.i.h.bf16 %v4191_v51  ;;  %v4192_v56 = vunpack.i.l.bf16 %v4191_v51 }
 0x558   :  { %v4188_v53 = vunpack.i.h.bf16 %v4186_v52  ;;  %v4187_v54 = vunpack.i.l.bf16 %v4186_v52  ;;  %v4222_v52 = vld [vmem:[%s5079_s3 + $0x20] sm:$0xff]  }
 0x55a   :  { %v1567_v57 = vsel %vm227_vm3, %v1306_v35, %v4188_v53  ;;  %v1550_v58 = vsel %vm227_vm3, %v1002_v28, %v4187_v54  ;;  %v4219_v28 = vld [vmem:[%s5080_s4 + $0x8] sm:$0xff]   ;;  %v3762_v54 = vld [vmem:[%s5081_s5] ss:$0 sm:$0xff] }
 0x55b   :  { %v4196_v59 = vpop.permute.xlu0 %4195  ;;  %v1552_v62 = vsel %vm1551_vm4, %v1550_v58, %v4192_v56  ;;  %v1568_v63 = vsel %vm1551_vm4, %v1567_v57, %v4193_v55  ;;  %v4223_v53 = vld [vmem:[%s5079_s3 + $0x28] sm:$0xff]  }
 0x55c   :  { %v4198_v60 = vunpack.i.h.bf16 %v4196_v59  ;;  %v4197_v61 = vunpack.i.l.bf16 %v4196_v59 }
 0x55e   :  { %v1569_v0 = vsel %vm1553_vm5, %v1568_v63, %v4198_v60  ;;  %v1554_v2 = vsel %vm1553_vm5, %v1552_v62, %v4197_v61 }
 0x55f   :  { %v1570_v3 = vpack.c.bf16 %v1569_v0, %v1554_v2  ;;  %v1740_v0 = vsub.s32 3, %v4708_v4 }
 0x561   :  { %4025 = vmatmul.mubr.msk.bf16.vlgmr.msra.gmra.mrb[20].mxu1 %vm166_vm2, %v1570_v3  ;;  %v1741_v2 = vrot.slane %v4714_v5, %v1740_v0 }
 0x562   :  { %4044 = vmatprep.mubr.msk.bf16.mxu1 %vm4356_vm0, %v4355_v1  ;;  %4037 = vmatpush3.bf16.msra.mxu1 %v4220_v29 }
 0x563   :  { %4038 = vmatprep.subr.bf16.mxu1 %v4355_v1 }
 0x566   :  { %4039 = vmatpush3.bf16.msra.mxu1 %v4221_v30 }
 0x567   :  { %4040 = vmatprep.subr.bf16.mxu1 %v4355_v1 }
 0x56a   :  { %4041 = vmatpush3.bf16.msra.mxu1 %v4222_v52 }
 0x56b   :  { %4042 = vmatprep.subr.bf16.mxu1 %v4355_v1 }
 0x56e   :  { %4043 = vmatpush3.bf16.msra.mxu1 %v4223_v53 }
 0x56f   :  { %4066 = vmatprep.subr.mxu1 %v4355_v1 }
 0x634   :  { %v1624_v7 = vpop.f32.mrb[20].mxu1 }
 0x635   :  { %v1625_v8 = vadd.f32 %v1624_v7, %v1574_v6  ;;  %v4026_v9 = vpop.f32.mrb[21].mxu1 }
 0x636   :  { %v1627_v10 = vpop.f32.mrb[22].mxu1 }
 0x637   :  { %v1628_v11 = vadd.f32 %v1627_v10, %v1574_v6  ;;  %v4027_v12 = vpop.f32.mrb[23].mxu1  ;;  %v1631_v13 = vadd.f32 %v1625_v8, %v4512_v21 }
 0x639   :  { %v1633_v14 = vsel %vm166_vm2, %v1631_v13, 0.0  ;;  %v1632_v15 = vadd.f32 %v1628_v11, %v4514_v23  ;;  %v4218_v23 = vld [vmem:[%s5080_s4] sm:$0xff]  }
 0x63a   :  { %1634 = vadd.xlane.f32.xlu1 %v1633_v14  ;;  %4029 = vmatpush3.bf16.msra.mxu0 %v4218_v23 }
 0x63b   :  { %v1636_v16 = vsel %vm166_vm2, %v1632_v15, 0.0  ;;  %4030 = vmatprep.subr.bf16.mxu0 %v4355_v1 }
 0x63c   :  { %1637 = vadd.xlane.f32.xlu0 %v1636_v16 }
 0x63e   :  { %4031 = vmatpush3.bf16.msra.mxu0 %v4219_v28 }
 0x63f   :  { %4048 = vmatprep.subr.bf16.mxu0 %v4355_v1 }
 0x6c7   :  { %v1635_v17 = vpop.xlane.xlu1 %1634 }
 0x6c8   :  { %v1640_v18 = vmul.f32 0.03125, %v1635_v17 }
 0x6c9   :  { %v1638_v19 = vpop.xlane.xlu0 %1637 }
 0x6ca   :  { %v1642_v20 = vsub.f32 %v1631_v13, %v1640_v18  ;;  %v1641_v22 = vmul.f32 0.03125, %v1638_v19 }
 0x6cc   :  { %v1643_v24 = vsub.f32 %v1632_v15, %v1641_v22  ;;  %v1644_v25 = vmul.f32 %v1642_v20, %v1642_v20 }
 0x6ce   :  { %v1646_v26 = vsel %vm166_vm2, %v1644_v25, 0.0  ;;  %v1645_v27 = vmul.f32 %v1643_v24, %v1643_v24 }
 0x6cf   :  { %1647 = vadd.xlane.f32.xlu0 %v1646_v26  ;;  %v4224_v26 = vld [vmem:[%s5077_s1 + $0x10] sm:$0xff]  }
 0x6d0   :  { %v1649_v21 = vsel %vm166_vm2, %v1645_v27, 0.0  ;;  %v4225_v27 = vld [vmem:[%s5077_s1 + $0x18] sm:$0xff]   ;;  %s4328_s1 = scalar_lea.vmem %s3661_s21, 32 }
 0x6d1   :  { %1650 = vadd.xlane.f32.xlu1 %v1649_v21  ;;  %p4329_p5 = scmp.ne.s32.totalorder %s3661_s21, %s4328_s1  ;;  %p4334_p7 = scmp.lt.s32.totalorder %s4328_s1, %s4328_s1 }
 0x6d3   :  { %p4335_p8 = por %p4334_p7, %p4333_p6 }
 0x6d5   :  { %p4336_p9 = pnand %p4335_p8, %p4329_p5 }
 0x75c   :  { %v1648_v31 = vpop.xlane.xlu0 %1647 }
 0x75d   :  { %v1652_v32 = vmul.f32 0.03125, %v1648_v31 }
 0x75e   :  { %v1651_v33 = vpop.xlane.xlu1 %1650 }
 0x75f   :  { %v1654_v34 = vadd.f32 1e-05, %v1652_v32  ;;  %v1653_v35 = vmul.f32 0.03125, %v1651_v33  ;;  %v1841_v32 = vsub.s32 4, %v4708_v4 }
 0x761   :  { %4268 = vrsqrt.f32 %v1654_v34  ;;  %v1655_v37 = vadd.f32 1e-05, %v1653_v35  ;;  %v1842_v33 = vrot.slane %v4714_v5, %v1841_v32  ;;  %v1847_v34 = vsub.s32 5, %v4708_v4  ;;  %v3833_v4 = vld [vmem:[%s5089_s11] ss:$0 sm:$0xff] }
 0x763   :  { %4270 = vrsqrt.f32 %v1655_v37 }
 0x76b   :  { %v4269_v42 = vpop.eup %4268 }
 0x76c   :  { %v1658_v43 = vmul.f32 %v4269_v42, %v1642_v20 }
 0x76d   :  { %v4271_v44 = vpop.eup %4270 }
 0x76e   :  { %v1664_v45 = vmul.f32 %v1663_v40, %v1658_v43  ;;  %v1659_v46 = vmul.f32 %v4271_v44, %v1643_v24  ;;  %v1848_v44 = vrot.slane %v4714_v5, %v1847_v34 }
 0x770   :  { %v1665_v48 = vmul.f32 %v1663_v40, %v1659_v46  ;;  %v1670_v49 = vadd.f32 %v1669_v47, %v1664_v45 }
 0x772   :  { %v1671_v50 = vadd.f32 %v1669_v47, %v1665_v48 }
 0x774   :  { %v1672_v51 = vpack.c.bf16 %v1671_v50, %v1670_v49 }
 0x776   :  { %4033 = vmatmul.mubr.msk.bf16.vlgmr.msra.gmra.mrb[20].mxu0 %vm166_vm2, %v1672_v51 }
 0x777   :  { %4052 = vmatprep.mubr.msk.bf16.mxu0 %vm4356_vm0, %v4355_v1  ;;  %4049 = vmatpush3.bf16.msra.mxu0 %v4224_v26 }
 0x778   :  { %4050 = vmatprep.subr.bf16.mxu0 %v4355_v1 }
 0x77b   :  { %4051 = vmatpush3.bf16.msra.mxu0 %v4225_v27 }
 0x77c   :  { %4056 = vmatprep.subr.mxu0 %v4355_v1 }
 0x849   :  { %v1728_v55 = vpop.f32.mrb[20].mxu0 }
 0x84a   :  { %v1729_v56 = vadd.f32 %v3762_v54, %v1728_v55  ;;  %v4034_v57 = vpop.f32.mrb[21].mxu0 }
 0x84b   :  { %v1731_v58 = vpop.f32.mrb[22].mxu0 }
 0x84c   :  { %v1732_v59 = vadd.f32 %v3762_v54, %v1731_v58  ;;  %v4035_v60 = vpop.f32.mrb[23].mxu0  ;;  %v1735_v61 = vmax.f32 %v1729_v56, 0.0 }
 0x84e   :  { %v1736_v62 = vmax.f32 %v1732_v59, 0.0 }
 0x850   :  { %v1737_v63 = vpack.c.bf16 %v1736_v62, %v1735_v61 }
 0x852   :  { %4045 = vmatmul.mubr.msk.bf16.vlgmr.msra.gmra.mrb[24].mxu1 %vm1766_vm6, %v1737_v63 }
 0x853   :  { %4068 = vmatprep.mubr.msk.f32.mxu1 %vm4356_vm0, %v4355_v1 }
 0x925   :  { %v1804_v3 = vpop.f32.mrb[24].mxu1 }
 0x926   :  { %v1805_v38 = vadd.f32 %v1804_v3, %v1741_v2  ;;  %v4046_v6 = vpop.f32.mrb[25].mxu1 }
 0x927   :  { %v1807_v7 = vpop.f32.mrb[26].mxu1 }
 0x928   :  { %v1808_v8 = vadd.f32 %v1807_v7, %v1741_v2  ;;  %v4047_v9 = vpop.f32.mrb[27].mxu1  ;;  %v1811_v10 = vadd.f32 %v1805_v38, %v1670_v49  ;;  %v3793_v49 = vld [vmem:[%s5078_s2 + $0x1] ss:$0 sm:$0xff] }
 0x92a   :  { %v1813_v11 = vsel %vm166_vm2, %v1811_v10, 0.0  ;;  %v1812_v12 = vadd.f32 %v1808_v8, %v1671_v50 }
 0x92b   :  { %1814 = vadd.xlane.f32.xlu0 %v1813_v11 }
 0x92c   :  { %v1816_v13 = vsel %vm166_vm2, %v1812_v12, 0.0 }
 0x92d   :  { %1817 = vadd.xlane.f32.xlu1 %v1816_v13 }
 0x9b8   :  { %v1815_v14 = vpop.xlane.xlu0 %1814 }
 0x9b9   :  { %v1819_v15 = vmul.f32 0.03125, %v1815_v14 }
 0x9ba   :  { %v1818_v16 = vpop.xlane.xlu1 %1817 }
 0x9bb   :  { %v1821_v17 = vsub.f32 %v1811_v10, %v1819_v15  ;;  %v1820_v18 = vmul.f32 0.03125, %v1818_v16 }
 0x9bd   :  { %v1822_v19 = vsub.f32 %v1812_v12, %v1820_v18  ;;  %v1823_v20 = vmul.f32 %v1821_v17, %v1821_v17 }
 0x9bf   :  { %v1825_v22 = vsel %vm166_vm2, %v1823_v20, 0.0  ;;  %v1824_v24 = vmul.f32 %v1822_v19, %v1822_v19 }
 0x9c0   :  { %1826 = vadd.xlane.f32.xlu0 %v1825_v22 }
 0x9c1   :  { %v1828_v25 = vsel %vm166_vm2, %v1824_v24, 0.0 }
 0x9c2   :  { %1829 = vadd.xlane.f32.xlu1 %v1828_v25 }
 0xa4d   :  { %v1827_v21 = vpop.xlane.xlu0 %1826 }
 0xa4e   :  { %v1831_v23 = vmul.f32 0.03125, %v1827_v21 }
 0xa4f   :  { %v1830_v28 = vpop.xlane.xlu1 %1829 }
 0xa50   :  { %v1833_v29 = vadd.f32 1e-05, %v1831_v23  ;;  %v1832_v30 = vmul.f32 0.03125, %v1830_v28 }
 0xa52   :  { %4272 = vrsqrt.f32 %v1833_v29  ;;  %v1834_v31 = vadd.f32 1e-05, %v1832_v30 }
 0xa54   :  { %4274 = vrsqrt.f32 %v1834_v31 }
 0xa5c   :  { %v4273_v35 = vpop.eup %4272 }
 0xa5d   :  { %v1837_v37 = vmul.f32 %v4273_v35, %v1821_v17 }
 0xa5e   :  { %v4275_v40 = vpop.eup %4274 }
 0xa5f   :  { %v1843_v42 = vmul.f32 %v1842_v33, %v1837_v37  ;;  %v1838_v43 = vmul.f32 %v4275_v40, %v1822_v19 }
 0xa61   :  { %v1844_v45 = vmul.f32 %v1842_v33, %v1838_v43  ;;  %v4790_v46 = vadd.f32 %v1848_v44, %v1843_v42 }
 0xa63   :  { %v4792_v47 = vadd.f32 %v1848_v44, %v1844_v45 }
 0xa65   :  { %v1879_v48 = vpack.c.bf16 %v4792_v47, %v4790_v46 }
 0xa67   :  { %4053 = vmatmul.mubr.msk.bf16.vlgmr.msra.gmra.mrb[24].mxu0 %vm166_vm2, %v1879_v48 }
 0xa68   :  { %4058 = vmatprep.mubr.msk.f32.mxu0 %vm4356_vm0, %v4355_v1 }
 0xb3a   :  { %v1935_v50 = vpop.f32.mrb[24].mxu0 }
 0xb3b   :  { %v4802_v51 = vadd.f32 %v3793_v49, %v1935_v50  ;;  %v4054_v5 = vpop.f32.mrb[25].mxu0 }
 0xb3c   :  { %v1938_v52 = vpop.f32.mrb[26].mxu0 }
 0xb3d   :  { %1945 = vrot.lane.b32.xlu1 %v4802_v51, %s4359_s29  ;;  %1943 = vrot.lane.b32.xlu0 %v4802_v51, %s4358_s18  ;;  %v4055_v53 = vpop.f32.mrb[27].mxu0  ;;  %v4808_v54 = vadd.f32 %v3793_v49, %v1938_v52 }
 0xb41   :  { %1947 = vrot.lane.b32.xlu1 %v4802_v51, %s4357_s17  ;;  %1950 = vrot.lane.b32.xlu0 %v4808_v54, %s4358_s18 }
 0xb45   :  { %1952 = vrot.lane.b32.xlu1 %v4808_v54, %s4359_s29  ;;  %1954 = vrot.lane.b32.xlu0 %v4808_v54, %s4357_s17 }
 0xb49   :  { %1956 = vrot.lane.b32.xlu1 %v4802_v51, %s4360_s30 }
 0xbaf   :  { %v4820_v55 = vpop.permute.xlu1 %1945  ;;  %v4822_v56 = vpop.permute.xlu0 %1943 }
 0xbb0   :  { %2108 = vrot.lane.b32.xlu1 %v4820_v55, %s4360_s30  ;;  %2032 = vrot.lane.b32.xlu0 %v4822_v56, %s4360_s30 }
 0xbb3   :  { %v4828_v57 = vpop.permute.xlu1 %1947  ;;  %v4834_v58 = vpop.permute.xlu0 %1950 }
 0xbb4   :  { %2260 = vrot.lane.b32.xlu1 %v4808_v54, %s4360_s30  ;;  %2184 = vrot.lane.b32.xlu0 %v4828_v57, %s4360_s30 }
 0xbb7   :  { %v4836_v59 = vpop.permute.xlu1 %1952  ;;  %v4842_v60 = vpop.permute.xlu0 %1954 }
 0xbb8   :  { %2412 = vrot.lane.b32.xlu1 %v4836_v59, %s4360_s30  ;;  %2336 = vrot.lane.b32.xlu0 %v4834_v58, %s4360_s30 }
 0xbbb   :  { %v1957_v61 = vpop.permute.xlu1 %1956 }
 0xbbc   :  { %4057 = vmatpush3.xpose.msk.msra.mxu0 %vm227_vm3, %v1957_v61  ;;  %2488 = vrot.lane.b32.xlu0 %v4842_v60, %s4360_s30 }
 0xbbd   :  { %4061 = vmatprep.subr.mxu0 %v4355_v1 }
 0xbbf   :  { %4059 = vmatmul.mubr.msk.f32.vlgmr.msra.gmra.mrb[18].mxu0 %vm227_vm3, %v4802_v51 }
 0xbc0   :  { %4063 = vmatprep.mubr.msk.f32.mxu0 %vm4356_vm0, %v4355_v1 }
 0xc22   :  { %v2109_v62 = vpop.permute.xlu1 %2108  ;;  %v2033_v63 = vpop.permute.xlu0 %2032 }
 0xc23   :  { %4062 = vmatpush3.xpose.msk.msra.mxu0 %vm227_vm3, %v2033_v63  ;;  %4067 = vmatpush3.xpose.msk.msra.mxu1 %vm227_vm3, %v2109_v62 }
 0xc24   :  { %4076 = vmatprep.subr.mxu1 %v4355_v1  ;;  %4071 = vmatprep.subr.mxu0 %v4355_v1 }
 0xc26   :  { %4069 = vmatmul.mubr.msk.f32.vlgmr.msra.gmra.mrb[18].mxu1 %vm227_vm3, %v4820_v55  ;;  %v2261_v2 = vpop.permute.xlu1 %2260  ;;  %4064 = vmatmul.mubr.msk.f32.vlgmr.msra.gmra.mrb[28].mxu0 %vm227_vm3, %v4822_v56  ;;  %v2185_v3 = vpop.permute.xlu0 %2184 }
 0xc27   :  { %4072 = vmatpush3.xpose.msk.msra.mxu0 %vm227_vm3, %v2185_v3  ;;  %4077 = vmatpush3.xpose.msk.msra.mxu1 %vm227_vm3, %v2261_v2 }
 0xc28   :  { %4073 = vmatprep.mubr.msk.f32.mxu0 %vm4356_vm0, %v4355_v1  ;;  %4078 = vmatprep.mubr.msk.f32.mxu1 %vm4356_vm0, %v4355_v1 }
 0xc29   :  { %4086 = vmatprep.subr.mxu1 %v4355_v1  ;;  %4081 = vmatprep.subr.mxu0 %v4355_v1 }
 0xc2a   :  { %4079 = vmatmul.mubr.msk.f32.vlgmr.msra.gmra.mrb[28].mxu1 %vm227_vm3, %v4808_v54  ;;  %v2413_v38 = vpop.permute.xlu1 %2412  ;;  %4074 = vmatmul.mubr.msk.f32.vlgmr.msra.gmra.mrb[30].mxu0 %vm227_vm3, %v4828_v57  ;;  %v2337_v6 = vpop.permute.xlu0 %2336 }
 0xc2b   :  { %4082 = vmatpush3.xpose.msk.msra.mxu0 %vm227_vm3, %v2337_v6  ;;  %4087 = vmatpush3.xpose.msk.msra.mxu1 %vm227_vm3, %v2413_v38 }
 0xc2c   :  { %4083 = vmatprep.mubr.msk.f32.mxu0 %vm4356_vm0, %v4355_v1  ;;  %4088 = vmatprep.mubr.msk.f32.mxu1 %vm4356_vm0, %v4355_v1 }
 0xc2d   :  { %4091 = vmatprep.subr.mxu0 %v4355_v1  ;;  %4096 = vmatprep.subr.mxu1 %v4355_v1 }
 0xc2e   :  { %4084 = vmatmul.mubr.msk.f32.vlgmr.msra.gmra.mrb[32].mxu0 %vm227_vm3, %v4834_v58  ;;  %4089 = vmatmul.mubr.msk.f32.vlgmr.msra.gmra.mrb[30].mxu1 %vm227_vm3, %v4836_v59  ;;  %v2489_v7 = vpop.permute.xlu0 %2488 }
 0xc2f   :  { %4092 = vmatpush3.xpose.msk.msra.mxu0 %vm227_vm3, %v2489_v7  ;;  %4093 = vmatprep.mubr.msk.f32.mxu0 %vm4356_vm0, %v4355_v1 }
 0xc30   :  { %4101 = vmatprep.subr.mxu0 %v4355_v1  ;;  %4098 = vmatprep.mubr.msk.f32.mxu1 %vm4356_vm0, %v4355_v1 }
 0xc32   :  { %4094 = vmatmul.mubr.msk.f32.vlgmr.msra.gmra.mrb[34].mxu0 %vm227_vm3, %v4842_v60 }
 0xc33   :  { %4103 = vmatprep.mubr.msk.f32.mxu0 %vm4356_vm0, %v4355_v1 }
 0xc92   :  { %v2028_v8 = vpop.f32.mrb[18].mxu0 }
 0xc93   :  { %v2564_v9 = vmul.f32 0.35355338, %v2028_v8  ;;  %v4060_v10 = vpop.f32.mrb[19].mxu0 }
 0xc95   :  { %v2572_v11 = vsel %vm227_vm3, %v2564_v9, -inf }
 0xc96   :  { %2573 = vmax.xlane.f32.xlu1 %v2572_v11 }
 0xcf9   :  { %v2104_v12 = vpop.f32.mrb[28].mxu0  ;;  %v2180_v13 = vpop.f32.mrb[18].mxu1 }
 0xcfa   :  { %v2565_v14 = vmul.f32 0.35355338, %v2104_v12  ;;  %v4065_v15 = vpop.f32.mrb[29].mxu0  ;;  %v4070_v16 = vpop.f32.mrb[19].mxu1  ;;  %v2566_v17 = vmul.f32 0.35355338, %v2180_v13 }
 0xcfc   :  { %v2575_v18 = vsel %vm227_vm3, %v2565_v14, -inf  ;;  %v2578_v27 = vsel %vm227_vm3, %v2566_v17, -inf }
 0xcfd   :  { %v2332_v19 = vpop.f32.mrb[28].mxu1  ;;  %2576 = vmax.xlane.f32.xlu0 %v2575_v18  ;;  %v2256_v20 = vpop.f32.mrb[30].mxu0 }
 0xcfe   :  { %v2567_v22 = vmul.f32 0.35355338, %v2256_v20  ;;  %v4075_v24 = vpop.f32.mrb[31].mxu0  ;;  %v4080_v25 = vpop.f32.mrb[29].mxu1  ;;  %v2568_v26 = vmul.f32 0.35355338, %v2332_v19 }
 0xd00   :  { %v2581_v21 = vsel %vm227_vm3, %v2567_v22, -inf  ;;  %v2584_v35 = vsel %vm227_vm3, %v2568_v26, -inf }
 0xd01   :  { %v2484_v23 = vpop.f32.mrb[30].mxu1  ;;  %2579 = vmax.xlane.f32.xlu0 %v2578_v27  ;;  %2582 = vmax.xlane.f32.xlu1 %v2581_v21  ;;  %v2408_v28 = vpop.f32.mrb[32].mxu0 }
 0xd02   :  { %v2569_v29 = vmul.f32 0.35355338, %v2408_v28  ;;  %v4085_v30 = vpop.f32.mrb[33].mxu0  ;;  %v4090_v31 = vpop.f32.mrb[31].mxu1  ;;  %v2570_v33 = vmul.f32 0.35355338, %v2484_v23 }
 0xd04   :  { %v2587_v37 = vsel %vm227_vm3, %v2569_v29, -inf  ;;  %v2590_v44 = vsel %vm227_vm3, %v2570_v33, -inf }
 0xd05   :  { %2585 = vmax.xlane.f32.xlu0 %v2584_v35  ;;  %2588 = vmax.xlane.f32.xlu1 %v2587_v37  ;;  %v2560_v40 = vpop.f32.mrb[34].mxu0 }
 0xd06   :  { %v2571_v42 = vmul.f32 0.35355338, %v2560_v40  ;;  %v4095_v43 = vpop.f32.mrb[35].mxu0 }
 0xd08   :  { %v2593_v45 = vsel %vm227_vm3, %v2571_v42, -inf }
 0xd09   :  { %2591 = vmax.xlane.f32.xlu0 %v2590_v44  ;;  %2594 = vmax.xlane.f32.xlu1 %v2593_v45 }
 0xd1a   :  { %2736 = vrot.lane.b32.xlu1 %v4822_v56, %s4361_s25 }
 0xd1e   :  { %2812 = vrot.lane.b32.xlu1 %v4820_v55, %s4361_s25 }
 0xd1f   :  { %2660 = vrot.lane.b32.xlu0 %v4802_v51, %s4361_s25 }
 0xd22   :  { %2964 = vrot.lane.b32.xlu1 %v4808_v54, %s4361_s25 }
 0xd23   :  { %2888 = vrot.lane.b32.xlu0 %v4828_v57, %s4361_s25  ;;  %v2574_v48 = vpop.xlane.xlu1 %2573 }
 0xd24   :  { %v2596_v49 = vsub.f32 %v2564_v9, %v2574_v48 }
 0xd26   :  { %v2604_v50 = vmul.f32 1.442695, %v2596_v49 }
 0xd27   :  { %3040 = vrot.lane.b32.xlu0 %v4834_v58, %s4361_s25 }
 0xd28   :  { %4276 = vpow2.f32 %v2604_v50 }
 0xd32   :  { %v4914_v5 = vpop.eup %4276 }
 0xd33   :  { %v2620_v52 = vsel %vm227_vm3, %v4914_v5, 0.0 }
 0xd46   :  { %2621 = vadd.xlane.f32.xlu0 %v2620_v52 }
 0xd8a   :  { %v2577_v51 = vpop.xlane.xlu0 %2576 }
 0xd8b   :  { %v2597_v53 = vsub.f32 %v2565_v14, %v2577_v51 }
 0xd8d   :  { %v2606_v55 = vmul.f32 1.442695, %v2597_v53 }
 0xd8e   :  { %v2580_v54 = vpop.xlane.xlu0 %2579  ;;  %v2583_v56 = vpop.xlane.xlu1 %2582 }
 0xd8f   :  { %4278 = vpow2.f32 %v2606_v55  ;;  %v2598_v57 = vsub.f32 %v2566_v17, %v2580_v54  ;;  %v2599_v61 = vsub.f32 %v2567_v22, %v2583_v56 }
 0xd91   :  { %v2608_v62 = vmul.f32 1.442695, %v2598_v57  ;;  %v2610_v58 = vmul.f32 1.442695, %v2599_v61 }
 0xd92   :  { %v2586_v63 = vpop.xlane.xlu0 %2585  ;;  %v2589_v2 = vpop.xlane.xlu1 %2588 }
 0xd93   :  { %4280 = vpow2.f32 %v2608_v62  ;;  %v2600_v3 = vsub.f32 %v2568_v26, %v2586_v63  ;;  %v2601_v38 = vsub.f32 %v2569_v29, %v2589_v2 }
 0xd94   :  { %4282 = vpow2.f32 %v2610_v58 }
 0xd95   :  { %v2612_v6 = vmul.f32 1.442695, %v2600_v3  ;;  %v2614_v7 = vmul.f32 1.442695, %v2601_v38 }
 0xd96   :  { %v2592_v8 = vpop.xlane.xlu0 %2591  ;;  %v2595_v9 = vpop.xlane.xlu1 %2594 }
 0xd97   :  { %4284 = vpow2.f32 %v2612_v6  ;;  %v2602_v10 = vsub.f32 %v2570_v33, %v2592_v8  ;;  %v2603_v11 = vsub.f32 %v2571_v42, %v2595_v9 }
 0xd98   :  { %4286 = vpow2.f32 %v2614_v7 }
 0xd99   :  { %v4279_v12 = vpop.eup %4278  ;;  %v2616_v13 = vmul.f32 1.442695, %v2602_v10  ;;  %v2618_v14 = vmul.f32 1.442695, %v2603_v11  ;;  %v4226_v10 = vld [vmem:[%s5079_s3 + $0x30] sm:$0xff]  }
 0xd9a   :  { %v2661_v15 = vpop.permute.xlu0 %2660  ;;  %v2737_v16 = vpop.permute.xlu1 %2736  ;;  %v2623_v17 = vsel %vm227_vm3, %v4279_v12, 0.0 }
 0xd9b   :  { %4288 = vpow2.f32 %v2616_v13  ;;  %4097 = vmatpush3.msra.mxu1 %v2661_v15  ;;  %2624 = vadd.xlane.f32.xlu1 %v2623_v17 }
 0xd9c   :  { %4290 = vpow2.f32 %v2618_v14  ;;  %4102 = vmatpush3.msra.mxu0 %v2737_v16  ;;  %4106 = vmatprep.subr.mxu1 %v4355_v1  ;;  %v4227_v14 = vld [vmem:[%s5079_s3 + $0x38] sm:$0xff]  }
 0xd9d   :  { %v4281_v18 = vpop.eup %4280  ;;  %4111 = vmatprep.subr.mxu0 %v4355_v1 }
 0xd9e   :  { %v4283_v19 = vpop.eup %4282  ;;  %v2626_v20 = vsel %vm227_vm3, %v4281_v18, 0.0  ;;  %v2889_v30 = vpop.permute.xlu0 %2888 }
 0xd9f   :  { %2627 = vadd.xlane.f32.xlu0 %v2626_v20  ;;  %v2629_v22 = vsel %vm227_vm3, %v4283_v19, 0.0  ;;  %v2813_v40 = vpop.permute.xlu1 %2812 }
 0xda0   :  { %2630 = vadd.xlane.f32.xlu1 %v2629_v22 }
 0xda1   :  { %v4285_v24 = vpop.eup %4284 }
 0xda2   :  { %v4287_v25 = vpop.eup %4286  ;;  %v2632_v26 = vsel %vm227_vm3, %v4285_v24, 0.0  ;;  %v3041_v31 = vpop.permute.xlu0 %3040 }
 0xda3   :  { %2633 = vadd.xlane.f32.xlu0 %v2632_v26  ;;  %v2635_v27 = vsel %vm227_vm3, %v4287_v25, 0.0 }
 0xda4   :  { %2636 = vadd.xlane.f32.xlu1 %v2635_v27 }
 0xda5   :  { %v4925_v21 = vpop.eup %4288 }
 0xda6   :  { %v4927_v23 = vpop.eup %4290  ;;  %v2638_v28 = vsel %vm227_vm3, %v4925_v21, 0.0 }
 0xda7   :  { %2639 = vadd.xlane.f32.xlu0 %v2638_v28  ;;  %v2641_v29 = vsel %vm227_vm3, %v4927_v23, 0.0 }
 0xda8   :  { %2642 = vadd.xlane.f32.xlu1 %v2641_v29 }
 0xdb9   :  { %3116 = vrot.lane.b32.xlu1 %v4836_v59, %s4361_s25  ;;  %v2965_v59 = vpop.permute.xlu1 %2964 }
 0xdbd   :  { %3192 = vrot.lane.b32.xlu0 %v4842_v60, %s4361_s25 }
 0xdd3   :  { %v2622_v33 = vpop.xlane.xlu0 %2621 }
 0xdd4   :  { %4292 = vrcp.f32 %v2622_v33 }
 0xdde   :  { %v4293_v35 = vpop.eup %4292 }
 0xddf   :  { %v2652_v37 = vmul.f32 %v4293_v35, %v4914_v5 }
 0xde1   :  { %4099 = vmatmul.mubr.msk.f32.vlgmr.msra.gmra.mrb[32].mxu1 %vm227_vm3, %v2652_v37 }
 0xde2   :  { %4107 = vmatpush3.msra.mxu1 %v2813_v40  ;;  %4108 = vmatprep.mubr.msk.f32.mxu1 %vm4356_vm0, %v4355_v1 }
 0xde3   :  { %4116 = vmatprep.subr.mxu1 %v4355_v1 }
 0xe28   :  { %v2625_v42 = vpop.xlane.xlu1 %2624 }
 0xe29   :  { %4294 = vrcp.f32 %v2625_v42 }
 0xe2c   :  { %v2628_v60 = vpop.xlane.xlu0 %2627 }
 0xe2d   :  { %4296 = vrcp.f32 %v2628_v60  ;;  %v2631_v43 = vpop.xlane.xlu1 %2630 }
 0xe2e   :  { %4298 = vrcp.f32 %v2631_v43 }
 0xe30   :  { %v2634_v44 = vpop.xlane.xlu0 %2633 }
 0xe31   :  { %4300 = vrcp.f32 %v2634_v44  ;;  %v2637_v45 = vpop.xlane.xlu1 %2636 }
 0xe32   :  { %4302 = vrcp.f32 %v2637_v45 }
 0xe33   :  { %v4295_v48 = vpop.eup %4294 }
 0xe34   :  { %v2653_v49 = vmul.f32 %v4295_v48, %v4279_v12  ;;  %v2640_v50 = vpop.xlane.xlu0 %2639 }
 0xe35   :  { %4304 = vrcp.f32 %v2640_v50  ;;  %v2643_v5 = vpop.xlane.xlu1 %2642 }
 0xe36   :  { %4306 = vrcp.f32 %v2643_v5  ;;  %4104 = vmatmul.mubr.msk.f32.vlgmr.msra.gmra.mrb[36].mxu0 %vm227_vm3, %v2653_v49  ;;  %v4993_v49 = vld [vmem:[%s5082_s6 + $0x8] sm:$0xff] }
 0xe37   :  { %v4297_v52 = vpop.eup %4296  ;;  %4112 = vmatpush3.msra.mxu0 %v2889_v30  ;;  %4113 = vmatprep.mubr.msk.f32.mxu0 %vm4356_vm0, %v4355_v1  ;;  %v3302_v50 = vrot.slane %v4993_v49, %v1573_v36 }
 0xe38   :  { %v4299_v51 = vpop.eup %4298  ;;  %v2654_v53 = vmul.f32 %v4297_v52, %v4281_v18  ;;  %4121 = vmatprep.subr.mxu0 %v4355_v1  ;;  %v3193_v63 = vpop.permute.xlu0 %3192 }
 0xe39   :  { %v2655_v55 = vmul.f32 %v4299_v51, %v4283_v19  ;;  %v3117_v62 = vpop.permute.xlu1 %3116 }
 0xe3a   :  { %4109 = vmatmul.mubr.msk.f32.vlgmr.msra.gmra.mrb[34].mxu1 %vm227_vm3, %v2654_v53 }
 0xe3b   :  { %v4301_v54 = vpop.eup %4300  ;;  %4114 = vmatmul.mubr.msk.f32.vlgmr.msra.gmra.mrb[38].mxu0 %vm227_vm3, %v2655_v55  ;;  %4117 = vmatpush3.msra.mxu1 %v2965_v59 }
 0xe3c   :  { %v4303_v56 = vpop.eup %4302  ;;  %v2656_v57 = vmul.f32 %v4301_v54, %v4285_v24  ;;  %4122 = vmatpush3.msra.mxu0 %v3041_v31  ;;  %4118 = vmatprep.mubr.msk.f32.mxu1 %vm4356_vm0, %v4355_v1 }
 0xe3d   :  { %v2657_v61 = vmul.f32 %v4303_v56, %v4287_v25  ;;  %4123 = vmatprep.mubr.msk.f32.mxu0 %vm4356_vm0, %v4355_v1  ;;  %4126 = vmatprep.subr.mxu1 %v4355_v1 }
 0xe3e   :  { %4131 = vmatprep.subr.mxu0 %v4355_v1  ;;  %4119 = vmatmul.mubr.msk.f32.vlgmr.msra.gmra.mrb[36].mxu1 %vm227_vm3, %v2656_v57 }
 0xe3f   :  { %v4305_v58 = vpop.eup %4304  ;;  %4124 = vmatmul.mubr.msk.f32.vlgmr.msra.gmra.mrb[40].mxu0 %vm227_vm3, %v2657_v61  ;;  %4127 = vmatpush3.msra.mxu1 %v3117_v62 }
 0xe40   :  { %v4307_v2 = vpop.eup %4306  ;;  %v2658_v3 = vmul.f32 %v4305_v58, %v4925_v21  ;;  %4132 = vmatpush3.msra.mxu0 %v3193_v63  ;;  %4128 = vmatprep.mubr.msk.f32.mxu1 %vm4356_vm0, %v4355_v1 }
 0xe41   :  { %v2659_v38 = vmul.f32 %v4307_v2, %v4927_v23  ;;  %4133 = vmatprep.mubr.msk.f32.mxu0 %vm4356_vm0, %v4355_v1  ;;  %4136 = vmatprep.subr.bf16.mxu1 %v4355_v1 }
 0xe42   :  { %4129 = vmatmul.mubr.msk.f32.vlgmr.msra.gmra.mrb[38].mxu1 %vm227_vm3, %v2658_v3  ;;  %4144 = vmatprep.subr.bf16.mxu0 %v4355_v1 }
 0xe43   :  { %4134 = vmatmul.mubr.msk.f32.vlgmr.msra.gmra.mrb[42].mxu0 %vm227_vm3, %v2659_v38  ;;  %4140 = vmatprep.mubr.msk.bf16.mxu1 %vm4356_vm0, %v4355_v1 }
 0xe44   :  { %4148 = vmatprep.mubr.msk.bf16.mxu0 %vm4356_vm0, %v4355_v1  ;;  %4137 = vmatpush3.bf16.msra.mxu1 %v4226_v10  ;;  %v4230_v10 = vld [vmem:[%s5079_s3 + $0x40] sm:$0xff]  }
 0xe45   :  { %4138 = vmatprep.subr.bf16.mxu1 %v4355_v1 }
 0xe48   :  { %4139 = vmatpush3.bf16.msra.mxu1 %v4227_v14 }
 0xe49   :  { %4152 = vmatprep.subr.bf16.mxu1 %v4355_v1 }
 0xeb4   :  { %v2732_v6 = vpop.f32.mrb[32].mxu1 }
 0xeb5   :  { %v4100_v7 = vpop.f32.mrb[33].mxu1 }
 0xf09   :  { %v2808_v8 = vpop.f32.mrb[36].mxu0 }
 0xf0a   :  { %v4105_v9 = vpop.f32.mrb[37].mxu0 }
 0xf0b   :  { %v4229_v9 = vld [vmem:[%s5080_s4 + $0x18] sm:$0xff]  }
 0xf0d   :  { %v2884_v11 = vpop.f32.mrb[34].mxu1 }
 0xf0e   :  { %v2960_v12 = vpop.f32.mrb[38].mxu0  ;;  %v4110_v13 = vpop.f32.mrb[35].mxu1 }
 0xf0f   :  { %v4115_v15 = vpop.f32.mrb[39].mxu0 }
 0xf11   :  { %v3036_v16 = vpop.f32.mrb[36].mxu1 }
 0xf12   :  { %v3112_v17 = vpop.f32.mrb[40].mxu0  ;;  %v4120_v18 = vpop.f32.mrb[37].mxu1 }
 0xf13   :  { %v4199_v19 = vpack.i.bf16 %v3112_v17, %v2808_v8  ;;  %v4125_v20 = vpop.f32.mrb[41].mxu0 }
 0xf15   :  { %4200 = vrot.lane.b32.xlu1 %v4199_v19, %s4363_s20  ;;  %v3188_v22 = vpop.f32.mrb[38].mxu1  ;;  %v3390_v19 = vrot.slane %v4993_v49, %v1662_v39  ;;  %v4232_v39 = vld [vmem:[%s5079_s3 + $0x50] sm:$0xff]  }
 0xf16   :  { %v4204_v24 = vpack.i.bf16 %v3188_v22, %v2884_v11  ;;  %v3264_v25 = vpop.f32.mrb[42].mxu0  ;;  %v4130_v26 = vpop.f32.mrb[39].mxu1  ;;  %v4231_v11 = vld [vmem:[%s5079_s3 + $0x48] sm:$0xff]  }
 0xf17   :  { %v4209_v27 = vpack.i.bf16 %v3264_v25, %v2960_v12  ;;  %v4135_v21 = vpop.f32.mrb[43].mxu0  ;;  %v3396_v26 = vrot.slane %v4993_v49, %v1668_v41  ;;  %v4233_v41 = vld [vmem:[%s5079_s3 + $0x58] sm:$0xff]  }
 0xf18   :  { %4205 = vrot.lane.b32.xlu0 %v4204_v24, %s4362_s27 }
 0xf19   :  { %4210 = vrot.lane.b32.xlu1 %v4209_v27, %s4364_s28 }
 0xf87   :  { %v4201_v23 = vpop.permute.xlu1 %4200 }
 0xf88   :  { %v4203_v28 = vunpack.i.h.bf16 %v4201_v23  ;;  %v4202_v29 = vunpack.i.l.bf16 %v4201_v23 }
 0xf8a   :  { %v4206_v30 = vpop.permute.xlu0 %4205  ;;  %v3295_v37 = vsel %vm227_vm3, %v3036_v16, %v4203_v28  ;;  %v3280_v40 = vsel %vm227_vm3, %v2732_v6, %v4202_v29  ;;  %v3824_v29 = vld [vmem:[%s5081_s5 + $0x1] ss:$0 sm:$0xff] }
 0xf8b   :  { %v4208_v31 = vunpack.i.h.bf16 %v4206_v30  ;;  %v4207_v33 = vunpack.i.l.bf16 %v4206_v30  ;;  %v4211_v35 = vpop.permute.xlu1 %4210 }
 0xf8c   :  { %v4213_v59 = vunpack.i.h.bf16 %v4211_v35  ;;  %v4212_v42 = vunpack.i.l.bf16 %v4211_v35 }
 0xf8d   :  { %v3281_v60 = vsel %vm1551_vm4, %v3280_v40, %v4207_v33  ;;  %v3296_v43 = vsel %vm1551_vm4, %v3295_v37, %v4208_v31 }
 0xf8e   :  { %v3297_v44 = vsel %vm1553_vm5, %v3296_v43, %v4213_v59  ;;  %v3282_v45 = vsel %vm1553_vm5, %v3281_v60, %v4212_v42  ;;  %v3468_v43 = vrot.slane %v4993_v49, %v1740_v0 }
 0xf8f   :  { %v3298_v48 = vpack.c.bf16 %v3297_v44, %v3282_v45 }
 0xf91   :  { %4141 = vmatmul.mubr.msk.bf16.vlgmr.msra.gmra.mrb[40].mxu1 %vm166_vm2, %v3298_v48 }
 0xf92   :  { %4160 = vmatprep.mubr.msk.bf16.mxu1 %vm4356_vm0, %v4355_v1  ;;  %4153 = vmatpush3.bf16.msra.mxu1 %v4230_v10 }
 0xf93   :  { %4154 = vmatprep.subr.bf16.mxu1 %v4355_v1 }
 0xf96   :  { %4155 = vmatpush3.bf16.msra.mxu1 %v4231_v11  ;;  %v3568_v11 = vrot.slane %v4993_v49, %v1841_v32 }
 0xf97   :  { %4156 = vmatprep.subr.bf16.mxu1 %v4355_v1 }
 0xf9a   :  { %4157 = vmatpush3.bf16.msra.mxu1 %v4232_v39 }
 0xf9b   :  { %4158 = vmatprep.subr.bf16.mxu1 %v4355_v1 }
 0xf9e   :  { %4159 = vmatpush3.bf16.msra.mxu1 %v4233_v41 }
0x1064   :  { %v3352_v5 = vpop.f32.mrb[40].mxu1 }
0x1065   :  { %v3353_v52 = vadd.f32 %v3352_v5, %v3302_v50  ;;  %v4142_v51 = vpop.f32.mrb[41].mxu1 }
0x1066   :  { %v3355_v53 = vpop.f32.mrb[42].mxu1 }
0x1067   :  { %v3356_v55 = vadd.f32 %v3355_v53, %v3302_v50  ;;  %v4143_v54 = vpop.f32.mrb[43].mxu1  ;;  %v3359_v56 = vadd.f32 %v3353_v52, %v4790_v46 }
0x1069   :  { %v3361_v57 = vsel %vm166_vm2, %v3359_v56, 0.0  ;;  %v3360_v61 = vadd.f32 %v3356_v55, %v4792_v47  ;;  %v4228_v47 = vld [vmem:[%s5080_s4 + $0x10] sm:$0xff]  }
0x106a   :  { %3362 = vadd.xlane.f32.xlu0 %v3361_v57  ;;  %4145 = vmatpush3.bf16.msra.mxu0 %v4228_v47 }
0x106b   :  { %v3364_v62 = vsel %vm166_vm2, %v3360_v61, 0.0  ;;  %4146 = vmatprep.subr.bf16.mxu0 %v4355_v1 }
0x106c   :  { %3365 = vadd.xlane.f32.xlu1 %v3364_v62 }
0x106e   :  { %4147 = vmatpush3.bf16.msra.mxu0 %v4229_v9 }
0x106f   :  { %4164 = vmatprep.subr.bf16.mxu0 %v4355_v1 }
0x10f7   :  { %v3363_v58 = vpop.xlane.xlu0 %3362 }
0x10f8   :  { %v3367_v63 = vmul.f32 0.03125, %v3363_v58 }
0x10f9   :  { %v3366_v2 = vpop.xlane.xlu1 %3365 }
0x10fa   :  { %v3369_v36 = vsub.f32 %v3359_v56, %v3367_v63  ;;  %v3368_v3 = vmul.f32 0.03125, %v3366_v2 }
0x10fc   :  { %v3370_v38 = vsub.f32 %v3360_v61, %v3368_v3  ;;  %v3371_v6 = vmul.f32 %v3369_v36, %v3369_v36 }
0x10fe   :  { %v3373_v7 = vsel %vm166_vm2, %v3371_v6, 0.0  ;;  %v3372_v8 = vmul.f32 %v3370_v38, %v3370_v38  ;;  %v4235_v6 = vld [vmem:[%s5083_s7 + $0x8] sm:$0xff]  }
0x10ff   :  { %3374 = vadd.xlane.f32.xlu0 %v3373_v7 }
0x1100   :  { %v3376_v46 = vsel %vm166_vm2, %v3372_v8, 0.0 }
0x1103   :  { %3377 = vadd.xlane.f32.xlu0 %v3376_v46 }
0x118c   :  { %v3375_v12 = vpop.xlane.xlu0 %3374 }
0x118d   :  { %v3379_v13 = vmul.f32 0.03125, %v3375_v12 }
0x118f   :  { %v3381_v14 = vadd.f32 1e-05, %v3379_v13  ;;  %v3574_v13 = vrot.slane %v4993_v49, %v1847_v34 }
0x1190   :  { %v3378_v15 = vpop.xlane.xlu0 %3377 }
0x1191   :  { %4308 = vrsqrt.f32 %v3381_v14  ;;  %v3380_v16 = vmul.f32 0.03125, %v3378_v15 }
0x1193   :  { %v3382_v17 = vadd.f32 1e-05, %v3380_v16 }
0x1195   :  { %4310 = vrsqrt.f32 %v3382_v17 }
0x119b   :  { %v4309_v18 = vpop.eup %4308 }
0x119c   :  { %v3385_v20 = vmul.f32 %v4309_v18, %v3369_v36 }
0x119e   :  { %v3391_v24 = vmul.f32 %v3390_v19, %v3385_v20 }
0x119f   :  { %v4311_v22 = vpop.eup %4310 }
0x11a0   :  { %v3386_v25 = vmul.f32 %v4311_v22, %v3370_v38  ;;  %v3397_v21 = vadd.f32 %v3396_v26, %v3391_v24  ;;  %v4234_v38 = vld [vmem:[%s5083_s7] sm:$0xff]  }
0x11a2   :  { %v3392_v27 = vmul.f32 %v3390_v19, %v3386_v25 }
0x11a4   :  { %v3398_v23 = vadd.f32 %v3396_v26, %v3392_v27 }
0x11a6   :  { %v3399_v28 = vpack.c.bf16 %v3398_v23, %v3397_v21 }
0x11a8   :  { %4149 = vmatmul.mubr.msk.bf16.vlgmr.msra.gmra.mrb[44].mxu0 %vm166_vm2, %v3399_v28 }
0x11a9   :  { %4168 = vmatprep.mubr.msk.bf16.mxu0 %vm4356_vm0, %v4355_v1  ;;  %4165 = vmatpush3.bf16.msra.mxu0 %v4234_v38 }
0x11aa   :  { %4166 = vmatprep.subr.bf16.mxu0 %v4355_v1 }
0x11ad   :  { %4167 = vmatpush3.bf16.msra.mxu0 %v4235_v6 }
0x127b   :  { %v3455_v30 = vpop.f32.mrb[44].mxu0 }
0x127c   :  { %v3456_v31 = vadd.f32 %v3824_v29, %v3455_v30  ;;  %v4150_v33 = vpop.f32.mrb[45].mxu0 }
0x127d   :  { %v3458_v35 = vpop.f32.mrb[46].mxu0 }
0x127e   :  { %v3459_v37 = vadd.f32 %v3824_v29, %v3458_v35  ;;  %v4151_v40 = vpop.f32.mrb[47].mxu0  ;;  %v3462_v59 = vmax.f32 %v3456_v31, 0.0 }
0x1280   :  { %v3463_v42 = vmax.f32 %v3459_v37, 0.0 }
0x1282   :  { %v3464_v60 = vpack.c.bf16 %v3463_v42, %v3462_v59 }
0x1284   :  { %4161 = vmatmul.mubr.msk.bf16.vlgmr.msra.gmra.mrb[44].mxu1 %vm1766_vm6, %v3464_v60 }
0x1357   :  { %v3530_v44 = vpop.f32.mrb[44].mxu1 }
0x1358   :  { %v3531_v45 = vadd.f32 %v3530_v44, %v3468_v43  ;;  %v4162_v48 = vpop.f32.mrb[45].mxu1 }
0x1359   :  { %v3533_v50 = vpop.f32.mrb[46].mxu1 }
0x135a   :  { %v3534_v5 = vadd.f32 %v3533_v50, %v3468_v43  ;;  %v4163_v52 = vpop.f32.mrb[47].mxu1  ;;  %v3537_v51 = vadd.f32 %v3531_v45, %v3397_v21 }
0x135c   :  { %v3539_v53 = vsel %vm166_vm2, %v3537_v51, 0.0  ;;  %v3538_v55 = vadd.f32 %v3534_v5, %v3398_v23 }
0x135d   :  { %3540 = vadd.xlane.f32.xlu1 %v3539_v53 }
0x135e   :  { %v3542_v54 = vsel %vm166_vm2, %v3538_v55, 0.0 }
0x135f   :  { %3543 = vadd.xlane.f32.xlu0 %v3542_v54 }
0x13ea   :  { %v3541_v56 = vpop.xlane.xlu1 %3540 }
0x13eb   :  { %v3545_v57 = vmul.f32 0.03125, %v3541_v56 }
0x13ec   :  { %v3544_v61 = vpop.xlane.xlu0 %3543 }
0x13ed   :  { %v3547_v62 = vsub.f32 %v3537_v51, %v3545_v57  ;;  %v3546_v58 = vmul.f32 0.03125, %v3544_v61 }
0x13ef   :  { %v3548_v0 = vsub.f32 %v3538_v55, %v3546_v58  ;;  %v3549_v63 = vmul.f32 %v3547_v62, %v3547_v62 }
0x13f1   :  { %v3551_v2 = vsel %vm166_vm2, %v3549_v63, 0.0  ;;  %v3550_v36 = vmul.f32 %v3548_v0, %v3548_v0 }
0x13f2   :  { %3552 = vadd.xlane.f32.xlu1 %v3551_v2 }
0x13f3   :  { %v3554_v3 = vsel %vm166_vm2, %v3550_v36, 0.0 }
0x13f4   :  { %3555 = vadd.xlane.f32.xlu0 %v3554_v3 }
0x147f   :  { %v3553_v7 = vpop.xlane.xlu1 %3552 }
0x1480   :  { %v3557_v8 = vmul.f32 0.03125, %v3553_v7 }
0x1481   :  { %v3556_v46 = vpop.xlane.xlu0 %3555 }
0x1482   :  { %v3559_v47 = vadd.f32 1e-05, %v3557_v8  ;;  %v3558_v9 = vmul.f32 0.03125, %v3556_v46 }
0x1484   :  { %4312 = vrsqrt.f32 %v3559_v47  ;;  %v3560_v10 = vadd.f32 1e-05, %v3558_v9 }
0x1486   :  { %4314 = vrsqrt.f32 %v3560_v10 }
0x148e   :  { %v4313_v12 = vpop.eup %4312 }
0x148f   :  { %v3563_v14 = vmul.f32 %v4313_v12, %v3547_v62 }
0x1490   :  { %v4315_v1 = vpop.eup %4314 }
0x1491   :  { %v3569_v15 = vmul.f32 %v3568_v11, %v3563_v14  ;;  %v3564_v16 = vmul.f32 %v4315_v1, %v3548_v0 }
0x1493   :  { %v3575_v17 = vadd.f32 %v3574_v13, %v3569_v15  ;;  %v3570_v18 = vmul.f32 %v3568_v11, %v3564_v16 }
0x1495   :  { %v3576_v19 = vadd.f32 %v3574_v13, %v3570_v18  ;;  %v3578_v20 = vrot.slane %v3575_v17, 7 }
0x1497   :  { %v3581_v22 = vrot.slane %v3576_v19, 6 }
0x1499   :  { %v3584_v24 = vsel %vm3583_vm7, %v3578_v20, %v3581_v22 }
0x149a   :  { %v3585_v25 = vpack.c.bf16 %v3584_v24, %v3584_v24 }
0x149c   :  { %4169 = vmatmul.mubr.msk.bf16.vlgmr.msra.gmra.mrb[48].mxu0 %vm166_vm2, %v3585_v25 }
0x156f   :  { %v3646_v32 = vpop.f32.mrb[48].mxu0 }
0x1570   :  { %v3647_v34 = vadd.f32 %v3833_v4, %v3646_v32  ;;  %v4170_v49 = vpop.f32.mrb[49].mxu0 }
0x1571   :  { %v3649_v26 = vpop.f32.mrb[50].mxu0 }
0x1572   :  { %v4171_v27 = vpop.f32.mrb[51].mxu0  ;;  %3653 = vst.msk [vmem:[#allocation5] sm:$0x3] %vm3652_vm8, %v3647_v34 }
0x1573   :  { %4339 = shalt.err (!%p4336_p9)
}
0x1574   :  { %s5090_s17 = sld [smem:[#allocation10_spill]] }
0x157a   :  { %s4340_s18 = scalar_lea.hbm %s5090_s17, 32 }
0x157b   :  { %p4341_p10 = scmp.ne.s32.totalorder %s5090_s17, %s4340_s18  ;;  %p4344_p11 = scmp.lt.u32.totalorder %s4340_s18, %s5090_s17 }
0x157d   :  { %p4346_p12 = pnand %p4344_p11, %p4341_p10 }
0x157f   :  { %4349 = shalt.err (!%p4346_p12)
}
0x1580   :  { %3663 = dma.vmem_to_hbm [thread:$0]  %s3661_s21, 32, %s5090_s17, [#allocation6]  }
0x1581   :  { %4352 = dma.done.wait [#allocation6], 32  }
0x1582   :  { %4353 = vsyncadd [#allocation6], 4294967264 }
0x1583   :  { %3667 = vsyncpa [#allocation6], 1 }

</bundles_post_ra>
